<compile_context>
chip_gen: v5e
topology: v5e:2x2
jax: 0.10.0
libtpu: 0.0.40
codegen_flags: <defaults>
</compile_context>

<pallas_src>
import jax
import jax.numpy as jnp
from jax.experimental import pallas as pl
from jax.experimental.pallas import tpu as pltpu


# ----------------------------- Pallas kernel --------------------------------

def _custom_block_kernel(x_ref, w1_ref, b1_ref, w2_ref, b2_ref,
                         prow_ref, pcol_ref, o_ref, pad1, pad2):
    # x_ref   : (Bblk, H, W*Cin)     lane-dense input rows (lanes = w*Cin + ci)
    # w1_ref  : (3, W*Cin, W*C)      block-banded conv1 weights (kw taps + width pad folded in)
    # b1_ref  : (1, W*C)             conv1 bias tiled over W
    # w2_ref  : (3, W*C, W*C)        block-banded conv2 weights
    # b2_ref  : (1, W*C)
    # prow_ref: (2, Ho, H)           even/odd row selectors (H pool)
    # pcol_ref: (2, W*C, Wo*C)       even/odd column selectors (W pool)
    # o_ref   : (Bblk, Ho, Wo*C)     lane-dense pooled output
    # pad1    : (Bblk, H+2, W*Cin)   VMEM scratch, height halo only
    # pad2    : (Bblk, H+2, W*C)
    Bblk, H, Win = x_ref.shape
    Nc = w1_ref.shape[-1]

    zrow1 = jnp.zeros((1, Win), jnp.float32)
    zrow2 = jnp.zeros((1, Nc), jnp.float32)

    def conv3x3_relu(pad, w_ref, b_ref, b):
        # 3 matmuls (one per kh) against block-banded weights; f32 MXU accumulation.
        acc = jnp.dot(pad[b, 0:H, :], w_ref[0], preferred_element_type=jnp.float32)
        acc = acc + jnp.dot(pad[b, 1:H + 1, :], w_ref[1], preferred_element_type=jnp.float32)
        acc = acc + jnp.dot(pad[b, 2:H + 2, :], w_ref[2], preferred_element_type=jnp.float32)
        return jnp.maximum(acc + b_ref[...], 0.0)            # fused bias + ReLU, (H, W*C)

    for b in range(Bblk):                                    # Bblk is 1 or 2: unrolled at trace time
        # ---- conv1 + ReLU: zero only the 2 halo rows; interior store is lane-dense ----
        pad1[b, 0:1, :] = zrow1
        pad1[b, H + 1:H + 2, :] = zrow1
        pad1[b, 1:H + 1, :] = x_ref[b]
        y1 = conv3x3_relu(pad1, w1_ref, b1_ref, b)           # (H, W*C)

        # ---- conv2 + ReLU: intermediate activation never leaves VMEM ----
        pad2[b, 0:1, :] = zrow2
        pad2[b, H + 1:H + 2, :] = zrow2
        pad2[b, 1:H + 1, :] = y1
        y2 = conv3x3_relu(pad2, w2_ref, b2_ref, b)           # (H, W*C)

        # ---- 2x2 / stride-2 max-pool as selection matmuls + elementwise max ----
        ph = jnp.maximum(
            jnp.dot(prow_ref[0], y2, preferred_element_type=jnp.float32),
            jnp.dot(prow_ref[1], y2, preferred_element_type=jnp.float32))     # (Ho, W*C)
        o_ref[b] = jnp.maximum(
            jnp.dot(ph, pcol_ref[0], preferred_element_type=jnp.float32),
            jnp.dot(ph, pcol_ref[1], preferred_element_type=jnp.float32))     # (Ho, Wo*C)


# ------------------------------- Wrapper -------------------------------------

def _band_conv_weight(w_oihw, W):
    """OIHW 3x3 weights -> (3, W*Cin, W*Cout) block-banded matrices.

    big[kh, win*Cin+ci, wout*Cout+co] = w_hwio[kh, win-wout+1, ci, co] (0 where kw out of range),
    folding the kw taps and the width zero-padding into a single matmul per kh.
    """
    w = jnp.transpose(w_oihw, (2, 3, 1, 0))                  # OIHW -> HWIO  (3, 3, Cin, Cout)
    KH, KW, Cin, Cout = w.shape
    win = jnp.arange(W)[:, None]
    wout = jnp.arange(W)[None, :]
    kw = win - wout + 1                                      # (W, W)
    valid = (kw >= 0) & (kw < KW)
    big = w[:, jnp.clip(kw, 0, KW - 1), :, :]                # (KH, win, wout, Cin, Cout)
    big = jnp.where(valid[None, :, :, None, None], big, 0.0)
    big = jnp.transpose(big, (0, 1, 3, 2, 4))                # (KH, win, Cin, wout, Cout)
    return big.reshape(KH, W * Cin, W * Cout)


def _pool_selectors(H, W, C, dtype=jnp.float32):
    """Even/odd selection matrices so 2x2 maxpool = matmul + max (no lane/sublane repacks)."""
    Ho, Wo = H // 2, W // 2
    rows = jnp.stack([
        jnp.zeros((Ho, H), dtype).at[jnp.arange(Ho), 2 * jnp.arange(Ho) + p].set(1.0)
        for p in range(2)])                                  # (2, Ho, H)
    eye_c = jnp.eye(C, dtype=dtype)
    cols = jnp.stack([
        jnp.kron(jnp.zeros((W, Wo), dtype).at[2 * jnp.arange(Wo) + p, jnp.arange(Wo)].set(1.0),
                 eye_c)
        for p in range(2)])                                  # (2, W*C, Wo*C)
    return rows, cols


def _num_parallel_tensorcores():
    # 2 TensorCores share one Pallas grid on megacore (v4/v5p) and v7x; 1 otherwise / unknown.
    try:
        kind = jax.devices()[0].device_kind.lower()
    except Exception:
        return 1
    return 2 if any(t in kind for t in ("v4", "v5p", "v7")) else 1


def custom_block_forward(x_nchw, params):
    """NCHW in/out (PyTorch convention); lane-dense fused Pallas kernel internally."""
    B, Cin, H, W = x_nchw.shape
    C = params["w1"].shape[0]
    Ho, Wo = H // 2, W // 2
    Win, Nc, No = W * Cin, W * C, Wo * C

    # Lane-dense boundary layouts + weight repacking (plain-JAX glue only).
    x = jnp.transpose(x_nchw, (0, 2, 3, 1)).reshape(B, H, Win)     # lanes = w*Cin + ci
    w1 = _band_conv_weight(params["w1"], W)                        # (3, Win, Nc)
    w2 = _band_conv_weight(params["w2"], W)                        # (3, Nc, Nc)
    b1 = jnp.tile(params["b1"], W).reshape(1, Nc)
    b2 = jnp.tile(params["b2"], W).reshape(1, Nc)
    prow, pcol = _pool_selectors(H, W, C)

    # Single grid step on 1-TC chips (v5e/v6e); 2-way parallel batch split on 2-TC chips.
    n_tc = _num_parallel_tensorcores()
    grid_b = n_tc if (n_tc > 1 and B % n_tc == 0) else 1
    bpg = B // grid_b

    flops = (2 * B * H * (3 * Win * Nc + 3 * Nc * Nc)
             + 2 * B * (2 * Ho * H * Nc + 2 * Ho * Nc * No))
    bytes_accessed = 4 * (x.size + w1.size + w2.size + b1.size + b2.size
                          + prow.size + pcol.size + B * Ho * No)

    y = pl.pallas_call(
        _custom_block_kernel,
        out_shape=jax.ShapeDtypeStruct((B, Ho, No), jnp.float32),
        grid_spec=pltpu.PrefetchScalarGridSpec(
            num_scalar_prefetch=0,
            grid=(grid_b,),
            in_specs=[
                pl.BlockSpec((bpg, H, Win), lambda i: (i, 0, 0)),
                pl.BlockSpec((3, Win, Nc), lambda i: (0, 0, 0)),   # weights stay VMEM-resident
                pl.BlockSpec((1, Nc), lambda i: (0, 0)),
                pl.BlockSpec((3, Nc, Nc), lambda i: (0, 0, 0)),
                pl.BlockSpec((1, Nc), lambda i: (0, 0)),
                pl.BlockSpec((2, Ho, H), lambda i: (0, 0, 0)),
                pl.BlockSpec((2, Nc, No), lambda i: (0, 0, 0)),
            ],
            out_specs=pl.BlockSpec((bpg, Ho, No), lambda i: (i, 0, 0)),
            scratch_shapes=[
                pltpu.VMEM((bpg, H + 2, Win), jnp.float32),
                pltpu.VMEM((bpg, H + 2, Nc), jnp.float32),
            ],
        ),
        compiler_params=pltpu.CompilerParams(
            dimension_semantics=("parallel",),
            vmem_limit_bytes=32 * 1024 * 1024,
        ),
        cost_estimate=pl.CostEstimate(flops=flops, transcendentals=0,
                                      bytes_accessed=bytes_accessed),
    )(x, w1, b1, w2, b2, prow, pcol)

    # (B, Ho, Wo*C) lane-dense -> NCHW
    return jnp.transpose(y.reshape(B, Ho, Wo, C), (0, 3, 1, 2))


# ------------------------- Params / reference / main -------------------------

def xavier_uniform(key, shape):
    # shape = (out_ch, in_ch, k, k), matching nn.init.xavier_uniform_.
    fan_in = shape[1] * shape[2] * shape[3]
    fan_out = shape[0] * shape[2] * shape[3]
    limit = (6.0 / (fan_in + fan_out)) ** 0.5
    return jax.random.uniform(key, shape, jnp.float32, -limit, limit)


def ref_forward(x_nchw, params):
    # Pure-JAX reference of the PyTorch module semantics.
    def conv(x, w, b):
        y = jax.lax.conv_general_dilated(
            x, w, window_strides=(1, 1), padding=((1, 1), (1, 1)),
            dimension_numbers=("NCHW", "OIHW", "NCHW"))
        return jax.nn.relu(y + b[None, :, None, None])
    y = conv(x_nchw, params["w1"], params["b1"])
    y = conv(y, params["w2"], params["b2"])
    B, C, H, W = y.shape
    y = y.reshape(B, C, H // 2, 2, W // 2, 2)
    return jnp.max(y, axis=(3, 5))


if __name__ == "__main__":
    B, Cin, Cout, H, W = 2, 4, 8, 16, 16

    key = jax.random.PRNGKey(0)
    kx, kw1, kw2 = jax.random.split(key, 3)
    x = jax.random.normal(kx, (B, Cin, H, W), jnp.float32)
    params = {
        "w1": xavier_uniform(kw1, (Cout, Cin, 3, 3)),
        "b1": jnp.zeros((Cout,), jnp.float32),
        "w2": xavier_uniform(kw2, (Cout, Cout, 3, 3)),
        "b2": jnp.zeros((Cout,), jnp.float32),
    }

    out = jax.block_until_ready(jax.jit(custom_block_forward)(x, params))
    ref = jax.block_until_ready(ref_forward(x, params))

    assert out.shape == (B, Cout, H // 2, W // 2), out.shape
    assert jnp.allclose(out, ref, atol=1e-4, rtol=1e-4), "mismatch vs reference"

    print("KERNEL_OK")
</pallas_src>

<mosaic_0001>
module attributes {stable_mosaic.version = 11 : i64} {
  func.func @_custom_block_kernel(%arg0: i32, %arg1: memref<2x16x64xf32, #tpu.memory_space<vmem>>, %arg2: memref<3x64x128xf32, #tpu.memory_space<vmem>>, %arg3: memref<1x128xf32, #tpu.memory_space<vmem>>, %arg4: memref<3x128x128xf32, #tpu.memory_space<vmem>>, %arg5: memref<1x128xf32, #tpu.memory_space<vmem>>, %arg6: memref<2x8x16xf32, #tpu.memory_space<vmem>>, %arg7: memref<2x128x64xf32, #tpu.memory_space<vmem>>, %arg8: memref<2x8x64xf32, #tpu.memory_space<vmem>>, %arg9: memref<2x18x64xf32, #tpu.memory_space<vmem>>, %arg10: memref<2x18x128xf32, #tpu.memory_space<vmem>>) attributes {dimension_semantics = [#tpu.dimension_semantics<parallel>], iteration_bounds = array<i64: 1>, scalar_prefetch = 0 : i64, scratch_operands = 2 : i64, tpu.core_type = #tpu.core_type<tc>, window_params = [{transform_indices = @transform_0, window_bounds = array<i64: 2, 16, 64>}, {pipeline_mode = #tpu.pipeline_mode<synchronous>, transform_indices = @transform_1, window_bounds = array<i64: 3, 64, 128>}, {pipeline_mode = #tpu.pipeline_mode<synchronous>, transform_indices = @transform_2, window_bounds = array<i64: 1, 128>}, {pipeline_mode = #tpu.pipeline_mode<synchronous>, transform_indices = @transform_3, window_bounds = array<i64: 3, 128, 128>}, {pipeline_mode = #tpu.pipeline_mode<synchronous>, transform_indices = @transform_4, window_bounds = array<i64: 1, 128>}, {pipeline_mode = #tpu.pipeline_mode<synchronous>, transform_indices = @transform_5, window_bounds = array<i64: 2, 8, 16>}, {pipeline_mode = #tpu.pipeline_mode<synchronous>, transform_indices = @transform_6, window_bounds = array<i64: 2, 128, 64>}, {transform_indices = @transform_7, window_bounds = array<i64: 2, 8, 64>}]} {
    %cst = arith.constant 0.000000e+00 : f32
    %0 = vector.broadcast %cst : f32 to vector<1x64xf32>
    %cst_0 = arith.constant 0.000000e+00 : f32
    %1 = vector.broadcast %cst_0 : f32 to vector<1x128xf32>
    %c0 = arith.constant 0 : index
    %c0_1 = arith.constant 0 : index
    %c0_2 = arith.constant 0 : index
    %2 = vector.load %arg9[%c0, %c0_1, %c0_2] : memref<2x18x64xf32, #tpu.memory_space<vmem>>, vector<1x1x64xf32>
    %3 = vector.shape_cast %2 : vector<1x1x64xf32> to vector<1x64xf32>
    %4 = vector.shape_cast %0 : vector<1x64xf32> to vector<1x1x64xf32>
    tpu.vector_store %arg9[%c0, %c0_1, %c0_2], %4 {strides = array<i32>} : memref<2x18x64xf32, #tpu.memory_space<vmem>>, vector<1x1x64xf32>,
    %c0_3 = arith.constant 0 : index
    %c17 = arith.constant 17 : index
    %c0_4 = arith.constant 0 : index
    %5 = vector.load %arg9[%c0_3, %c17, %c0_4] : memref<2x18x64xf32, #tpu.memory_space<vmem>>, vector<1x1x64xf32>
    %6 = vector.shape_cast %5 : vector<1x1x64xf32> to vector<1x64xf32>
    %7 = vector.shape_cast %0 : vector<1x64xf32> to vector<1x1x64xf32>
    tpu.vector_store %arg9[%c0_3, %c17, %c0_4], %7 {strides = array<i32>} : memref<2x18x64xf32, #tpu.memory_space<vmem>>, vector<1x1x64xf32>,
    %c0_5 = arith.constant 0 : index
    %c0_6 = arith.constant 0 : index
    %c0_7 = arith.constant 0 : index
    %8 = vector.load %arg1[%c0_5, %c0_6, %c0_7] : memref<2x16x64xf32, #tpu.memory_space<vmem>>, vector<1x16x64xf32>
    %9 = vector.shape_cast %8 : vector<1x16x64xf32> to vector<16x64xf32>
    %c0_8 = arith.constant 0 : index
    %c1 = arith.constant 1 : index
    %c0_9 = arith.constant 0 : index
    %10 = vector.load %arg9[%c0_8, %c1, %c0_9] : memref<2x18x64xf32, #tpu.memory_space<vmem>>, vector<1x16x64xf32>
    %11 = vector.shape_cast %10 : vector<1x16x64xf32> to vector<16x64xf32>
    %12 = vector.shape_cast %9 : vector<16x64xf32> to vector<1x16x64xf32>
    tpu.vector_store %arg9[%c0_8, %c1, %c0_9], %12 {strides = array<i32>} : memref<2x18x64xf32, #tpu.memory_space<vmem>>, vector<1x16x64xf32>,
    %c0_10 = arith.constant 0 : index
    %c0_11 = arith.constant 0 : index
    %c0_12 = arith.constant 0 : index
    %13 = vector.load %arg9[%c0_10, %c0_11, %c0_12] : memref<2x18x64xf32, #tpu.memory_space<vmem>>, vector<1x16x64xf32>
    %14 = vector.shape_cast %13 : vector<1x16x64xf32> to vector<16x64xf32>
    %c0_13 = arith.constant 0 : index
    %c0_14 = arith.constant 0 : index
    %c0_15 = arith.constant 0 : index
    %15 = vector.load %arg2[%c0_13, %c0_14, %c0_15] : memref<3x64x128xf32, #tpu.memory_space<vmem>>, vector<1x64x128xf32>
    %16 = vector.shape_cast %15 : vector<1x64x128xf32> to vector<64x128xf32>
    %cst_16 = arith.constant dense<0.000000e+00> : vector<16x128xf32>
    %17 = tpu.matmul %14, %16, %cst_16 {dimension_numbers = #tpu.dot_dimension_numbers<[1], [0], [0], [1], [0, 0, 1, 1], [], []>} : vector<16x64xf32>, vector<64x128xf32>, vector<16x128xf32> -> vector<16x128xf32>
    %c0_17 = arith.constant 0 : index
    %c1_18 = arith.constant 1 : index
    %c0_19 = arith.constant 0 : index
    %18 = vector.load %arg9[%c0_17, %c1_18, %c0_19] : memref<2x18x64xf32, #tpu.memory_space<vmem>>, vector<1x16x64xf32>
    %19 = vector.shape_cast %18 : vector<1x16x64xf32> to vector<16x64xf32>
    %c1_20 = arith.constant 1 : index
    %c0_21 = arith.constant 0 : index
    %c0_22 = arith.constant 0 : index
    %20 = vector.load %arg2[%c1_20, %c0_21, %c0_22] : memref<3x64x128xf32, #tpu.memory_space<vmem>>, vector<1x64x128xf32>
    %21 = vector.shape_cast %20 : vector<1x64x128xf32> to vector<64x128xf32>
    %cst_23 = arith.constant dense<0.000000e+00> : vector<16x128xf32>
    %22 = tpu.matmul %19, %21, %cst_23 {dimension_numbers = #tpu.dot_dimension_numbers<[1], [0], [0], [1], [0, 0, 1, 1], [], []>} : vector<16x64xf32>, vector<64x128xf32>, vector<16x128xf32> -> vector<16x128xf32>
    %23 = arith.addf %17, %22 : vector<16x128xf32>
    %c0_24 = arith.constant 0 : index
    %c2 = arith.constant 2 : index
    %c0_25 = arith.constant 0 : index
    %24 = vector.load %arg9[%c0_24, %c2, %c0_25] : memref<2x18x64xf32, #tpu.memory_space<vmem>>, vector<1x16x64xf32>
    %25 = vector.shape_cast %24 : vector<1x16x64xf32> to vector<16x64xf32>
    %c2_26 = arith.constant 2 : index
    %c0_27 = arith.constant 0 : index
    %c0_28 = arith.constant 0 : index
    %26 = vector.load %arg2[%c2_26, %c0_27, %c0_28] : memref<3x64x128xf32, #tpu.memory_space<vmem>>, vector<1x64x128xf32>
    %27 = vector.shape_cast %26 : vector<1x64x128xf32> to vector<64x128xf32>
    %cst_29 = arith.constant dense<0.000000e+00> : vector<16x128xf32>
    %28 = tpu.matmul %25, %27, %cst_29 {dimension_numbers = #tpu.dot_dimension_numbers<[1], [0], [0], [1], [0, 0, 1, 1], [], []>} : vector<16x64xf32>, vector<64x128xf32>, vector<16x128xf32> -> vector<16x128xf32>
    %29 = arith.addf %23, %28 : vector<16x128xf32>
    %c0_30 = arith.constant 0 : index
    %c0_31 = arith.constant 0 : index
    %30 = vector.load %arg3[%c0_30, %c0_31] : memref<1x128xf32, #tpu.memory_space<vmem>>, vector<1x128xf32>
    %31 = vector.broadcast %30 : vector<1x128xf32> to vector<16x128xf32>
    %32 = arith.addf %29, %31 : vector<16x128xf32>
    %cst_32 = arith.constant 0.000000e+00 : f32
    %33 = vector.broadcast %cst_32 : f32 to vector<16x128xf32>
    %34 = arith.maximumf %32, %33 : vector<16x128xf32>
    %c0_33 = arith.constant 0 : index
    %c0_34 = arith.constant 0 : index
    %c0_35 = arith.constant 0 : index
    %35 = vector.load %arg10[%c0_33, %c0_34, %c0_35] : memref<2x18x128xf32, #tpu.memory_space<vmem>>, vector<1x1x128xf32>
    %36 = vector.shape_cast %35 : vector<1x1x128xf32> to vector<1x128xf32>
    %37 = vector.shape_cast %1 : vector<1x128xf32> to vector<1x1x128xf32>
    tpu.vector_store %arg10[%c0_33, %c0_34, %c0_35], %37 {strides = array<i32>} : memref<2x18x128xf32, #tpu.memory_space<vmem>>, vector<1x1x128xf32>,
    %c0_36 = arith.constant 0 : index
    %c17_37 = arith.constant 17 : index
    %c0_38 = arith.constant 0 : index
    %38 = vector.load %arg10[%c0_36, %c17_37, %c0_38] : memref<2x18x128xf32, #tpu.memory_space<vmem>>, vector<1x1x128xf32>
    %39 = vector.shape_cast %38 : vector<1x1x128xf32> to vector<1x128xf32>
    %40 = vector.shape_cast %1 : vector<1x128xf32> to vector<1x1x128xf32>
    tpu.vector_store %arg10[%c0_36, %c17_37, %c0_38], %40 {strides = array<i32>} : memref<2x18x128xf32, #tpu.memory_space<vmem>>, vector<1x1x128xf32>,
    %c0_39 = arith.constant 0 : index
    %c1_40 = arith.constant 1 : index
    %c0_41 = arith.constant 0 : index
    %41 = vector.load %arg10[%c0_39, %c1_40, %c0_41] : memref<2x18x128xf32, #tpu.memory_space<vmem>>, vector<1x16x128xf32>
    %42 = vector.shape_cast %41 : vector<1x16x128xf32> to vector<16x128xf32>
    %43 = vector.shape_cast %34 : vector<16x128xf32> to vector<1x16x128xf32>
    tpu.vector_store %arg10[%c0_39, %c1_40, %c0_41], %43 {strides = array<i32>} : memref<2x18x128xf32, #tpu.memory_space<vmem>>, vector<1x16x128xf32>,
    %c0_42 = arith.constant 0 : index
    %c0_43 = arith.constant 0 : index
    %c0_44 = arith.constant 0 : index
    %44 = vector.load %arg10[%c0_42, %c0_43, %c0_44] : memref<2x18x128xf32, #tpu.memory_space<vmem>>, vector<1x16x128xf32>
    %45 = vector.shape_cast %44 : vector<1x16x128xf32> to vector<16x128xf32>
    %c0_45 = arith.constant 0 : index
    %c0_46 = arith.constant 0 : index
    %c0_47 = arith.constant 0 : index
    %46 = vector.load %arg4[%c0_45, %c0_46, %c0_47] : memref<3x128x128xf32, #tpu.memory_space<vmem>>, vector<1x128x128xf32>
    %47 = vector.shape_cast %46 : vector<1x128x128xf32> to vector<128x128xf32>
    %cst_48 = arith.constant dense<0.000000e+00> : vector<16x128xf32>
    %48 = tpu.matmul %45, %47, %cst_48 {dimension_numbers = #tpu.dot_dimension_numbers<[1], [0], [0], [1], [0, 0, 1, 1], [], []>} : vector<16x128xf32>, vector<128x128xf32>, vector<16x128xf32> -> vector<16x128xf32>
    %c0_49 = arith.constant 0 : index
    %c1_50 = arith.constant 1 : index
    %c0_51 = arith.constant 0 : index
    %49 = vector.load %arg10[%c0_49, %c1_50, %c0_51] : memref<2x18x128xf32, #tpu.memory_space<vmem>>, vector<1x16x128xf32>
    %50 = vector.shape_cast %49 : vector<1x16x128xf32> to vector<16x128xf32>
    %c1_52 = arith.constant 1 : index
    %c0_53 = arith.constant 0 : index
    %c0_54 = arith.constant 0 : index
    %51 = vector.load %arg4[%c1_52, %c0_53, %c0_54] : memref<3x128x128xf32, #tpu.memory_space<vmem>>, vector<1x128x128xf32>
    %52 = vector.shape_cast %51 : vector<1x128x128xf32> to vector<128x128xf32>
    %cst_55 = arith.constant dense<0.000000e+00> : vector<16x128xf32>
    %53 = tpu.matmul %50, %52, %cst_55 {dimension_numbers = #tpu.dot_dimension_numbers<[1], [0], [0], [1], [0, 0, 1, 1], [], []>} : vector<16x128xf32>, vector<128x128xf32>, vector<16x128xf32> -> vector<16x128xf32>
    %54 = arith.addf %48, %53 : vector<16x128xf32>
    %c0_56 = arith.constant 0 : index
    %c2_57 = arith.constant 2 : index
    %c0_58 = arith.constant 0 : index
    %55 = vector.load %arg10[%c0_56, %c2_57, %c0_58] : memref<2x18x128xf32, #tpu.memory_space<vmem>>, vector<1x16x128xf32>
    %56 = vector.shape_cast %55 : vector<1x16x128xf32> to vector<16x128xf32>
    %c2_59 = arith.constant 2 : index
    %c0_60 = arith.constant 0 : index
    %c0_61 = arith.constant 0 : index
    %57 = vector.load %arg4[%c2_59, %c0_60, %c0_61] : memref<3x128x128xf32, #tpu.memory_space<vmem>>, vector<1x128x128xf32>
    %58 = vector.shape_cast %57 : vector<1x128x128xf32> to vector<128x128xf32>
    %cst_62 = arith.constant dense<0.000000e+00> : vector<16x128xf32>
    %59 = tpu.matmul %56, %58, %cst_62 {dimension_numbers = #tpu.dot_dimension_numbers<[1], [0], [0], [1], [0, 0, 1, 1], [], []>} : vector<16x128xf32>, vector<128x128xf32>, vector<16x128xf32> -> vector<16x128xf32>
    %60 = arith.addf %54, %59 : vector<16x128xf32>
    %c0_63 = arith.constant 0 : index
    %c0_64 = arith.constant 0 : index
    %61 = vector.load %arg5[%c0_63, %c0_64] : memref<1x128xf32, #tpu.memory_space<vmem>>, vector<1x128xf32>
    %62 = vector.broadcast %61 : vector<1x128xf32> to vector<16x128xf32>
    %63 = arith.addf %60, %62 : vector<16x128xf32>
    %cst_65 = arith.constant 0.000000e+00 : f32
    %64 = vector.broadcast %cst_65 : f32 to vector<16x128xf32>
    %65 = arith.maximumf %63, %64 : vector<16x128xf32>
    %c0_66 = arith.constant 0 : index
    %c0_67 = arith.constant 0 : index
    %c0_68 = arith.constant 0 : index
    %66 = vector.load %arg6[%c0_66, %c0_67, %c0_68] : memref<2x8x16xf32, #tpu.memory_space<vmem>>, vector<1x8x16xf32>
    %67 = vector.shape_cast %66 : vector<1x8x16xf32> to vector<8x16xf32>
    %cst_69 = arith.constant dense<0.000000e+00> : vector<8x128xf32>
    %68 = tpu.matmul %67, %65, %cst_69 {dimension_numbers = #tpu.dot_dimension_numbers<[1], [0], [0], [1], [0, 0, 1, 1], [], []>} : vector<8x16xf32>, vector<16x128xf32>, vector<8x128xf32> -> vector<8x128xf32>
    %c1_70 = arith.constant 1 : index
    %c0_71 = arith.constant 0 : index
    %c0_72 = arith.constant 0 : index
    %69 = vector.load %arg6[%c1_70, %c0_71, %c0_72] : memref<2x8x16xf32, #tpu.memory_space<vmem>>, vector<1x8x16xf32>
    %70 = vector.shape_cast %69 : vector<1x8x16xf32> to vector<8x16xf32>
    %cst_73 = arith.constant dense<0.000000e+00> : vector<8x128xf32>
    %71 = tpu.matmul %70, %65, %cst_73 {dimension_numbers = #tpu.dot_dimension_numbers<[1], [0], [0], [1], [0, 0, 1, 1], [], []>} : vector<8x16xf32>, vector<16x128xf32>, vector<8x128xf32> -> vector<8x128xf32>
    %72 = arith.maximumf %68, %71 : vector<8x128xf32>
    %c0_74 = arith.constant 0 : index
    %c0_75 = arith.constant 0 : index
    %c0_76 = arith.constant 0 : index
    %73 = vector.load %arg7[%c0_74, %c0_75, %c0_76] : memref<2x128x64xf32, #tpu.memory_space<vmem>>, vector<1x128x64xf32>
    %74 = vector.shape_cast %73 : vector<1x128x64xf32> to vector<128x64xf32>
    %cst_77 = arith.constant dense<0.000000e+00> : vector<8x64xf32>
    %75 = tpu.matmul %72, %74, %cst_77 {dimension_numbers = #tpu.dot_dimension_numbers<[1], [0], [0], [1], [0, 0, 1, 1], [], []>} : vector<8x128xf32>, vector<128x64xf32>, vector<8x64xf32> -> vector<8x64xf32>
    %c1_78 = arith.constant 1 : index
    %c0_79 = arith.constant 0 : index
    %c0_80 = arith.constant 0 : index
    %76 = vector.load %arg7[%c1_78, %c0_79, %c0_80] : memref<2x128x64xf32, #tpu.memory_space<vmem>>, vector<1x128x64xf32>
    %77 = vector.shape_cast %76 : vector<1x128x64xf32> to vector<128x64xf32>
    %cst_81 = arith.constant dense<0.000000e+00> : vector<8x64xf32>
    %78 = tpu.matmul %72, %77, %cst_81 {dimension_numbers = #tpu.dot_dimension_numbers<[1], [0], [0], [1], [0, 0, 1, 1], [], []>} : vector<8x128xf32>, vector<128x64xf32>, vector<8x64xf32> -> vector<8x64xf32>
    %79 = arith.maximumf %75, %78 : vector<8x64xf32>
    %c0_82 = arith.constant 0 : index
    %c0_83 = arith.constant 0 : index
    %c0_84 = arith.constant 0 : index
    %80 = vector.load %arg8[%c0_82, %c0_83, %c0_84] : memref<2x8x64xf32, #tpu.memory_space<vmem>>, vector<1x8x64xf32>
    %81 = vector.shape_cast %80 : vector<1x8x64xf32> to vector<8x64xf32>
    %82 = vector.shape_cast %79 : vector<8x64xf32> to vector<1x8x64xf32>
    tpu.vector_store %arg8[%c0_82, %c0_83, %c0_84], %82 {strides = array<i32>} : memref<2x8x64xf32, #tpu.memory_space<vmem>>, vector<1x8x64xf32>,
    %c1_85 = arith.constant 1 : index
    %c0_86 = arith.constant 0 : index
    %c0_87 = arith.constant 0 : index
    %83 = vector.load %arg9[%c1_85, %c0_86, %c0_87] : memref<2x18x64xf32, #tpu.memory_space<vmem>>, vector<1x1x64xf32>
    %84 = vector.shape_cast %83 : vector<1x1x64xf32> to vector<1x64xf32>
    %85 = vector.shape_cast %0 : vector<1x64xf32> to vector<1x1x64xf32>
    tpu.vector_store %arg9[%c1_85, %c0_86, %c0_87], %85 {strides = array<i32>} : memref<2x18x64xf32, #tpu.memory_space<vmem>>, vector<1x1x64xf32>,
    %c1_88 = arith.constant 1 : index
    %c17_89 = arith.constant 17 : index
    %c0_90 = arith.constant 0 : index
    %86 = vector.load %arg9[%c1_88, %c17_89, %c0_90] : memref<2x18x64xf32, #tpu.memory_space<vmem>>, vector<1x1x64xf32>
    %87 = vector.shape_cast %86 : vector<1x1x64xf32> to vector<1x64xf32>
    %88 = vector.shape_cast %0 : vector<1x64xf32> to vector<1x1x64xf32>
    tpu.vector_store %arg9[%c1_88, %c17_89, %c0_90], %88 {strides = array<i32>} : memref<2x18x64xf32, #tpu.memory_space<vmem>>, vector<1x1x64xf32>,
    %c1_91 = arith.constant 1 : index
    %c0_92 = arith.constant 0 : index
    %c0_93 = arith.constant 0 : index
    %89 = vector.load %arg1[%c1_91, %c0_92, %c0_93] : memref<2x16x64xf32, #tpu.memory_space<vmem>>, vector<1x16x64xf32>
    %90 = vector.shape_cast %89 : vector<1x16x64xf32> to vector<16x64xf32>
    %c1_94 = arith.constant 1 : index
    %c1_95 = arith.constant 1 : index
    %c0_96 = arith.constant 0 : index
    %91 = vector.load %arg9[%c1_94, %c1_95, %c0_96] : memref<2x18x64xf32, #tpu.memory_space<vmem>>, vector<1x16x64xf32>
    %92 = vector.shape_cast %91 : vector<1x16x64xf32> to vector<16x64xf32>
    %93 = vector.shape_cast %90 : vector<16x64xf32> to vector<1x16x64xf32>
    tpu.vector_store %arg9[%c1_94, %c1_95, %c0_96], %93 {strides = array<i32>} : memref<2x18x64xf32, #tpu.memory_space<vmem>>, vector<1x16x64xf32>,
    %c1_97 = arith.constant 1 : index
    %c0_98 = arith.constant 0 : index
    %c0_99 = arith.constant 0 : index
    %94 = vector.load %arg9[%c1_97, %c0_98, %c0_99] : memref<2x18x64xf32, #tpu.memory_space<vmem>>, vector<1x16x64xf32>
    %95 = vector.shape_cast %94 : vector<1x16x64xf32> to vector<16x64xf32>
    %c0_100 = arith.constant 0 : index
    %c0_101 = arith.constant 0 : index
    %c0_102 = arith.constant 0 : index
    %96 = vector.load %arg2[%c0_100, %c0_101, %c0_102] : memref<3x64x128xf32, #tpu.memory_space<vmem>>, vector<1x64x128xf32>
    %97 = vector.shape_cast %96 : vector<1x64x128xf32> to vector<64x128xf32>
    %cst_103 = arith.constant dense<0.000000e+00> : vector<16x128xf32>
    %98 = tpu.matmul %95, %97, %cst_103 {dimension_numbers = #tpu.dot_dimension_numbers<[1], [0], [0], [1], [0, 0, 1, 1], [], []>} : vector<16x64xf32>, vector<64x128xf32>, vector<16x128xf32> -> vector<16x128xf32>
    %c1_104 = arith.constant 1 : index
    %c1_105 = arith.constant 1 : index
    %c0_106 = arith.constant 0 : index
    %99 = vector.load %arg9[%c1_104, %c1_105, %c0_106] : memref<2x18x64xf32, #tpu.memory_space<vmem>>, vector<1x16x64xf32>
    %100 = vector.shape_cast %99 : vector<1x16x64xf32> to vector<16x64xf32>
    %c1_107 = arith.constant 1 : index
    %c0_108 = arith.constant 0 : index
    %c0_109 = arith.constant 0 : index
    %101 = vector.load %arg2[%c1_107, %c0_108, %c0_109] : memref<3x64x128xf32, #tpu.memory_space<vmem>>, vector<1x64x128xf32>
    %102 = vector.shape_cast %101 : vector<1x64x128xf32> to vector<64x128xf32>
    %cst_110 = arith.constant dense<0.000000e+00> : vector<16x128xf32>
    %103 = tpu.matmul %100, %102, %cst_110 {dimension_numbers = #tpu.dot_dimension_numbers<[1], [0], [0], [1], [0, 0, 1, 1], [], []>} : vector<16x64xf32>, vector<64x128xf32>, vector<16x128xf32> -> vector<16x128xf32>
    %104 = arith.addf %98, %103 : vector<16x128xf32>
    %c1_111 = arith.constant 1 : index
    %c2_112 = arith.constant 2 : index
    %c0_113 = arith.constant 0 : index
    %105 = vector.load %arg9[%c1_111, %c2_112, %c0_113] : memref<2x18x64xf32, #tpu.memory_space<vmem>>, vector<1x16x64xf32>
    %106 = vector.shape_cast %105 : vector<1x16x64xf32> to vector<16x64xf32>
    %c2_114 = arith.constant 2 : index
    %c0_115 = arith.constant 0 : index
    %c0_116 = arith.constant 0 : index
    %107 = vector.load %arg2[%c2_114, %c0_115, %c0_116] : memref<3x64x128xf32, #tpu.memory_space<vmem>>, vector<1x64x128xf32>
    %108 = vector.shape_cast %107 : vector<1x64x128xf32> to vector<64x128xf32>
    %cst_117 = arith.constant dense<0.000000e+00> : vector<16x128xf32>
    %109 = tpu.matmul %106, %108, %cst_117 {dimension_numbers = #tpu.dot_dimension_numbers<[1], [0], [0], [1], [0, 0, 1, 1], [], []>} : vector<16x64xf32>, vector<64x128xf32>, vector<16x128xf32> -> vector<16x128xf32>
    %110 = arith.addf %104, %109 : vector<16x128xf32>
    %c0_118 = arith.constant 0 : index
    %c0_119 = arith.constant 0 : index
    %111 = vector.load %arg3[%c0_118, %c0_119] : memref<1x128xf32, #tpu.memory_space<vmem>>, vector<1x128xf32>
    %112 = vector.broadcast %111 : vector<1x128xf32> to vector<16x128xf32>
    %113 = arith.addf %110, %112 : vector<16x128xf32>
    %cst_120 = arith.constant 0.000000e+00 : f32
    %114 = vector.broadcast %cst_120 : f32 to vector<16x128xf32>
    %115 = arith.maximumf %113, %114 : vector<16x128xf32>
    %c1_121 = arith.constant 1 : index
    %c0_122 = arith.constant 0 : index
    %c0_123 = arith.constant 0 : index
    %116 = vector.load %arg10[%c1_121, %c0_122, %c0_123] : memref<2x18x128xf32, #tpu.memory_space<vmem>>, vector<1x1x128xf32>
    %117 = vector.shape_cast %116 : vector<1x1x128xf32> to vector<1x128xf32>
    %118 = vector.shape_cast %1 : vector<1x128xf32> to vector<1x1x128xf32>
    tpu.vector_store %arg10[%c1_121, %c0_122, %c0_123], %118 {strides = array<i32>} : memref<2x18x128xf32, #tpu.memory_space<vmem>>, vector<1x1x128xf32>,
    %c1_124 = arith.constant 1 : index
    %c17_125 = arith.constant 17 : index
    %c0_126 = arith.constant 0 : index
    %119 = vector.load %arg10[%c1_124, %c17_125, %c0_126] : memref<2x18x128xf32, #tpu.memory_space<vmem>>, vector<1x1x128xf32>
    %120 = vector.shape_cast %119 : vector<1x1x128xf32> to vector<1x128xf32>
    %121 = vector.shape_cast %1 : vector<1x128xf32> to vector<1x1x128xf32>
    tpu.vector_store %arg10[%c1_124, %c17_125, %c0_126], %121 {strides = array<i32>} : memref<2x18x128xf32, #tpu.memory_space<vmem>>, vector<1x1x128xf32>,
    %c1_127 = arith.constant 1 : index
    %c1_128 = arith.constant 1 : index
    %c0_129 = arith.constant 0 : index
    %122 = vector.load %arg10[%c1_127, %c1_128, %c0_129] : memref<2x18x128xf32, #tpu.memory_space<vmem>>, vector<1x16x128xf32>
    %123 = vector.shape_cast %122 : vector<1x16x128xf32> to vector<16x128xf32>
    %124 = vector.shape_cast %115 : vector<16x128xf32> to vector<1x16x128xf32>
    tpu.vector_store %arg10[%c1_127, %c1_128, %c0_129], %124 {strides = array<i32>} : memref<2x18x128xf32, #tpu.memory_space<vmem>>, vector<1x16x128xf32>,
    %c1_130 = arith.constant 1 : index
    %c0_131 = arith.constant 0 : index
    %c0_132 = arith.constant 0 : index
    %125 = vector.load %arg10[%c1_130, %c0_131, %c0_132] : memref<2x18x128xf32, #tpu.memory_space<vmem>>, vector<1x16x128xf32>
    %126 = vector.shape_cast %125 : vector<1x16x128xf32> to vector<16x128xf32>
    %c0_133 = arith.constant 0 : index
    %c0_134 = arith.constant 0 : index
    %c0_135 = arith.constant 0 : index
    %127 = vector.load %arg4[%c0_133, %c0_134, %c0_135] : memref<3x128x128xf32, #tpu.memory_space<vmem>>, vector<1x128x128xf32>
    %128 = vector.shape_cast %127 : vector<1x128x128xf32> to vector<128x128xf32>
    %cst_136 = arith.constant dense<0.000000e+00> : vector<16x128xf32>
    %129 = tpu.matmul %126, %128, %cst_136 {dimension_numbers = #tpu.dot_dimension_numbers<[1], [0], [0], [1], [0, 0, 1, 1], [], []>} : vector<16x128xf32>, vector<128x128xf32>, vector<16x128xf32> -> vector<16x128xf32>
    %c1_137 = arith.constant 1 : index
    %c1_138 = arith.constant 1 : index
    %c0_139 = arith.constant 0 : index
    %130 = vector.load %arg10[%c1_137, %c1_138, %c0_139] : memref<2x18x128xf32, #tpu.memory_space<vmem>>, vector<1x16x128xf32>
    %131 = vector.shape_cast %130 : vector<1x16x128xf32> to vector<16x128xf32>
    %c1_140 = arith.constant 1 : index
    %c0_141 = arith.constant 0 : index
    %c0_142 = arith.constant 0 : index
    %132 = vector.load %arg4[%c1_140, %c0_141, %c0_142] : memref<3x128x128xf32, #tpu.memory_space<vmem>>, vector<1x128x128xf32>
    %133 = vector.shape_cast %132 : vector<1x128x128xf32> to vector<128x128xf32>
    %cst_143 = arith.constant dense<0.000000e+00> : vector<16x128xf32>
    %134 = tpu.matmul %131, %133, %cst_143 {dimension_numbers = #tpu.dot_dimension_numbers<[1], [0], [0], [1], [0, 0, 1, 1], [], []>} : vector<16x128xf32>, vector<128x128xf32>, vector<16x128xf32> -> vector<16x128xf32>
    %135 = arith.addf %129, %134 : vector<16x128xf32>
    %c1_144 = arith.constant 1 : index
    %c2_145 = arith.constant 2 : index
    %c0_146 = arith.constant 0 : index
    %136 = vector.load %arg10[%c1_144, %c2_145, %c0_146] : memref<2x18x128xf32, #tpu.memory_space<vmem>>, vector<1x16x128xf32>
    %137 = vector.shape_cast %136 : vector<1x16x128xf32> to vector<16x128xf32>
    %c2_147 = arith.constant 2 : index
    %c0_148 = arith.constant 0 : index
    %c0_149 = arith.constant 0 : index
    %138 = vector.load %arg4[%c2_147, %c0_148, %c0_149] : memref<3x128x128xf32, #tpu.memory_space<vmem>>, vector<1x128x128xf32>
    %139 = vector.shape_cast %138 : vector<1x128x128xf32> to vector<128x128xf32>
    %cst_150 = arith.constant dense<0.000000e+00> : vector<16x128xf32>
    %140 = tpu.matmul %137, %139, %cst_150 {dimension_numbers = #tpu.dot_dimension_numbers<[1], [0], [0], [1], [0, 0, 1, 1], [], []>} : vector<16x128xf32>, vector<128x128xf32>, vector<16x128xf32> -> vector<16x128xf32>
    %141 = arith.addf %135, %140 : vector<16x128xf32>
    %c0_151 = arith.constant 0 : index
    %c0_152 = arith.constant 0 : index
    %142 = vector.load %arg5[%c0_151, %c0_152] : memref<1x128xf32, #tpu.memory_space<vmem>>, vector<1x128xf32>
    %143 = vector.broadcast %142 : vector<1x128xf32> to vector<16x128xf32>
    %144 = arith.addf %141, %143 : vector<16x128xf32>
    %cst_153 = arith.constant 0.000000e+00 : f32
    %145 = vector.broadcast %cst_153 : f32 to vector<16x128xf32>
    %146 = arith.maximumf %144, %145 : vector<16x128xf32>
    %c0_154 = arith.constant 0 : index
    %c0_155 = arith.constant 0 : index
    %c0_156 = arith.constant 0 : index
    %147 = vector.load %arg6[%c0_154, %c0_155, %c0_156] : memref<2x8x16xf32, #tpu.memory_space<vmem>>, vector<1x8x16xf32>
    %148 = vector.shape_cast %147 : vector<1x8x16xf32> to vector<8x16xf32>
    %cst_157 = arith.constant dense<0.000000e+00> : vector<8x128xf32>
    %149 = tpu.matmul %148, %146, %cst_157 {dimension_numbers = #tpu.dot_dimension_numbers<[1], [0], [0], [1], [0, 0, 1, 1], [], []>} : vector<8x16xf32>, vector<16x128xf32>, vector<8x128xf32> -> vector<8x128xf32>
    %c1_158 = arith.constant 1 : index
    %c0_159 = arith.constant 0 : index
    %c0_160 = arith.constant 0 : index
    %150 = vector.load %arg6[%c1_158, %c0_159, %c0_160] : memref<2x8x16xf32, #tpu.memory_space<vmem>>, vector<1x8x16xf32>
    %151 = vector.shape_cast %150 : vector<1x8x16xf32> to vector<8x16xf32>
    %cst_161 = arith.constant dense<0.000000e+00> : vector<8x128xf32>
    %152 = tpu.matmul %151, %146, %cst_161 {dimension_numbers = #tpu.dot_dimension_numbers<[1], [0], [0], [1], [0, 0, 1, 1], [], []>} : vector<8x16xf32>, vector<16x128xf32>, vector<8x128xf32> -> vector<8x128xf32>
    %153 = arith.maximumf %149, %152 : vector<8x128xf32>
    %c0_162 = arith.constant 0 : index
    %c0_163 = arith.constant 0 : index
    %c0_164 = arith.constant 0 : index
    %154 = vector.load %arg7[%c0_162, %c0_163, %c0_164] : memref<2x128x64xf32, #tpu.memory_space<vmem>>, vector<1x128x64xf32>
    %155 = vector.shape_cast %154 : vector<1x128x64xf32> to vector<128x64xf32>
    %cst_165 = arith.constant dense<0.000000e+00> : vector<8x64xf32>
    %156 = tpu.matmul %153, %155, %cst_165 {dimension_numbers = #tpu.dot_dimension_numbers<[1], [0], [0], [1], [0, 0, 1, 1], [], []>} : vector<8x128xf32>, vector<128x64xf32>, vector<8x64xf32> -> vector<8x64xf32>
    %c1_166 = arith.constant 1 : index
    %c0_167 = arith.constant 0 : index
    %c0_168 = arith.constant 0 : index
    %157 = vector.load %arg7[%c1_166, %c0_167, %c0_168] : memref<2x128x64xf32, #tpu.memory_space<vmem>>, vector<1x128x64xf32>
    %158 = vector.shape_cast %157 : vector<1x128x64xf32> to vector<128x64xf32>
    %cst_169 = arith.constant dense<0.000000e+00> : vector<8x64xf32>
    %159 = tpu.matmul %153, %158, %cst_169 {dimension_numbers = #tpu.dot_dimension_numbers<[1], [0], [0], [1], [0, 0, 1, 1], [], []>} : vector<8x128xf32>, vector<128x64xf32>, vector<8x64xf32> -> vector<8x64xf32>
    %160 = arith.maximumf %156, %159 : vector<8x64xf32>
    %c1_170 = arith.constant 1 : index
    %c0_171 = arith.constant 0 : index
    %c0_172 = arith.constant 0 : index
    %161 = vector.load %arg8[%c1_170, %c0_171, %c0_172] : memref<2x8x64xf32, #tpu.memory_space<vmem>>, vector<1x8x64xf32>
    %162 = vector.shape_cast %161 : vector<1x8x64xf32> to vector<8x64xf32>
    %163 = vector.shape_cast %160 : vector<8x64xf32> to vector<1x8x64xf32>
    tpu.vector_store %arg8[%c1_170, %c0_171, %c0_172], %163 {strides = array<i32>} : memref<2x8x64xf32, #tpu.memory_space<vmem>>, vector<1x8x64xf32>,
    return
  }
  func.func @transform_0(%arg0: i32) -> (i32, i32, i32) {
    %c0_i32 = arith.constant 0 : i32
    %c0_i32_0 = arith.constant 0 : i32
    %c0_i32_1 = arith.constant 0 : i32
    return %arg0, %c0_i32, %c0_i32_0 : i32, i32, i32
  }
  func.func @transform_1(%arg0: i32) -> (i32, i32, i32) {
    %c0_i32 = arith.constant 0 : i32
    %c0_i32_0 = arith.constant 0 : i32
    %c0_i32_1 = arith.constant 0 : i32
    %c0_i32_2 = arith.constant 0 : i32
    return %c0_i32, %c0_i32_0, %c0_i32_1 : i32, i32, i32
  }
  func.func @transform_2(%arg0: i32) -> (i32, i32) {
    %c0_i32 = arith.constant 0 : i32
    %c0_i32_0 = arith.constant 0 : i32
    %c0_i32_1 = arith.constant 0 : i32
    return %c0_i32, %c0_i32_0 : i32, i32
  }
  func.func @transform_3(%arg0: i32) -> (i32, i32, i32) {
    %c0_i32 = arith.constant 0 : i32
    %c0_i32_0 = arith.constant 0 : i32
    %c0_i32_1 = arith.constant 0 : i32
    %c0_i32_2 = arith.constant 0 : i32
    return %c0_i32, %c0_i32_0, %c0_i32_1 : i32, i32, i32
  }
  func.func @transform_4(%arg0: i32) -> (i32, i32) {
    %c0_i32 = arith.constant 0 : i32
    %c0_i32_0 = arith.constant 0 : i32
    %c0_i32_1 = arith.constant 0 : i32
    return %c0_i32, %c0_i32_0 : i32, i32
  }
  func.func @transform_5(%arg0: i32) -> (i32, i32, i32) {
    %c0_i32 = arith.constant 0 : i32
    %c0_i32_0 = arith.constant 0 : i32
    %c0_i32_1 = arith.constant 0 : i32
    %c0_i32_2 = arith.constant 0 : i32
    return %c0_i32, %c0_i32_0, %c0_i32_1 : i32, i32, i32
  }
  func.func @transform_6(%arg0: i32) -> (i32, i32, i32) {
    %c0_i32 = arith.constant 0 : i32
    %c0_i32_0 = arith.constant 0 : i32
    %c0_i32_1 = arith.constant 0 : i32
    %c0_i32_2 = arith.constant 0 : i32
    return %c0_i32, %c0_i32_0, %c0_i32_1 : i32, i32, i32
  }
  func.func @transform_7(%arg0: i32) -> (i32, i32, i32) {
    %c0_i32 = arith.constant 0 : i32
    %c0_i32_0 = arith.constant 0 : i32
    %c0_i32_1 = arith.constant 0 : i32
    return %arg0, %c0_i32, %c0_i32_0 : i32, i32, i32
  }
}

</mosaic_0001>

<bundles_post_ra>
// kernel: tile.13
= control target key start
LH: loop header
LB: loop body
LE: loop exit
PB: predicated region body
PF: predicated region fallthrough
CT: control target
= control target key end

     0   :  { %s28_s0 = inlined_call_operand.vmem [shape: f32[8], index: 0, kind: input, shape index: {}]   ;;  %s29_s1 = inlined_call_operand.vmem [shape: f32[16,8], index: 1, kind: output, shape index: {}]  }
   0x1   :  { %v4_v0 = vld [vmem:[%s28_s0] ss:$0 sm:$0xff] }
   0x2   :  { %5 = vst [vmem:[%s29_s1] sm:$0xff] %v4_v0 }
   0x3   :  { %8 = vst [vmem:[%s29_s1 + $0x8] sm:$0xff] %v4_v0 }

// kernel: tile.14
= control target key start
LH: loop header
LB: loop body
LE: loop exit
PB: predicated region body
PF: predicated region fallthrough
CT: control target
= control target key end

     0   :  { %s131_s10 = smov 120   ;;  %s132_s11 = smov 104   ;;  %vm3_vm0 = vcmask 64512   ;;  %vm9_vm1 = vcmask 1048512   ;;  %vm15_vm2 = vcmask 982912   ;;  %vm21_vm3 = vcmask 917312   ;;  %s207_s0 = inlined_call_operand.vmem [shape: f32[16,8], index: 0, kind: input, shape index: {}]   ;;  %s208_s1 = inlined_call_operand.vmem [shape: f32[1,128], index: 1, kind: output, shape index: {}]  }
   0x1   :  { %v101_v0 = vld [vmem:[%s207_s0 + $0xf] sm:$0x1]   ;;  %v103_v1 = vld [vmem:[%s207_s0 + $0xd] sm:$0x1]   ;;  %v105_v2 = vld [vmem:[%s207_s0 + $0xb] sm:$0x1]  }
   0x2   :  { %7 = vrot.lane.b32.xlu0 %v101_v0, %s131_s10  ;;  %19 = vrot.lane.b32.xlu1 %v103_v1, %s132_s11  ;;  %s133_s14 = smov 88   ;;  %v102_v3 = vld [vmem:[%s207_s0 + $0xe] sm:$0x1]   ;;  %v104_v4 = vld [vmem:[%s207_s0 + $0xc] sm:$0x1]   ;;  %s134_s19 = smov 112  }
   0x3   :  { %31 = vrot.lane.b32.xlu2 %v105_v2, %s133_s14  ;;  %s135_s20 = smov 96   ;;  %v106_v5 = vld [vmem:[%s207_s0 + $0xa] sm:$0x1]   ;;  %s136_s23 = smov 80   ;;  %v107_v6 = vld [vmem:[%s207_s0 + $0x9] sm:$0x1]  }
   0x4   :  { %v108_v7 = vld [vmem:[%s207_s0 + $0x8] sm:$0x1]   ;;  %s137_s28 = smov 72   ;;  %s138_s29 = smov 64   ;;  %v109_v8 = vld [vmem:[%s207_s0 + $0x7] sm:$0x1]  }
   0x5   :  { %s139_s3 = smov 56   ;;  %v110_v9 = vld [vmem:[%s207_s0 + $0x6] sm:$0x1]   ;;  %v111_v10 = vld [vmem:[%s207_s0 + $0x5] sm:$0x1]   ;;  %s140_s8 = smov 48  }
   0x6   :  { %s141_s9 = smov 40   ;;  %v112_v11 = vld [vmem:[%s207_s0 + $0x4] sm:$0x1]   ;;  %s142_s12 = smov 32   ;;  %v113_v12 = vld [vmem:[%s207_s0 + $0x3] sm:$0x1]  }
   0x7   :  { %v114_v13 = vld [vmem:[%s207_s0 + $0x2] sm:$0x1]   ;;  %s143_s17 = smov 24   ;;  %s144_s18 = smov 16   ;;  %v115_v14 = vld [vmem:[%s207_s0 + $0x1] sm:$0x1]  }
   0x8   :  { %s145_s21 = smov 8   ;;  %v2_v15 = vld [vmem:[%s207_s0] sm:$0x1]   ;;  %vm27_vm4 = vcmask 851712   ;;  %vm33_vm5 = vcmask 786112   ;;  %vm39_vm6 = vcmask 720512  }
   0x9   :  { %4 = vst.msk [vmem:[#allocation0] sm:$0x1] %vm3_vm0, %v2_v15   ;;  %vm45_vm7 = vcmask 654912   ;;  %vm51_vm8 = vcmask 589312   ;;  %vm57_vm9 = vcmask 523712   ;;  %vm63_vm10 = vcmask 458112  }
   0xa   :  { %13 = vrot.lane.b32.xlu0 %v102_v3, %s134_s19  ;;  %25 = vrot.lane.b32.xlu1 %v104_v4, %s135_s20  ;;  %vm69_vm11 = vcmask 392512   ;;  %vm75_vm12 = vcmask 326912   ;;  %vm81_vm13 = vcmask 261312   ;;  %vm87_vm14 = vcmask 195712  }
   0xb   :  { %37 = vrot.lane.b32.xlu2 %v106_v5, %s136_s23  ;;  %vm93_vm15 = vcmask 130112  }
  0x12   :  { %43 = vrot.lane.b32.xlu0 %v107_v6, %s137_s28  ;;  %49 = vrot.lane.b32.xlu1 %v108_v7, %s138_s29 }
  0x13   :  { %55 = vrot.lane.b32.xlu2 %v109_v8, %s139_s3 }
  0x1a   :  { %61 = vrot.lane.b32.xlu0 %v110_v9, %s140_s8  ;;  %67 = vrot.lane.b32.xlu1 %v111_v10, %s141_s9 }
  0x1b   :  { %73 = vrot.lane.b32.xlu2 %v112_v11, %s142_s12 }
  0x22   :  { %79 = vrot.lane.b32.xlu0 %v113_v12, %s143_s17  ;;  %85 = vrot.lane.b32.xlu1 %v114_v13, %s144_s18 }
  0x23   :  { %91 = vrot.lane.b32.xlu2 %v115_v14, %s145_s21 }
  0x5d   :  { %v32_v16 = vpop.permute.xlu2 %31  }
  0x65   :  { %v38_v17 = vpop.permute.xlu2 %37  }
  0x6d   :  { %v56_v18 = vpop.permute.xlu2 %55  }
  0x74   :  { %v8_v19 = vpop.permute.xlu0 %7   ;;  %v20_v20 = vpop.permute.xlu1 %19  }
  0x75   :  { %10 = vst.msk [vmem:[#allocation0] sm:$0x1] %vm9_vm1, %v8_v19   ;;  %v74_v21 = vpop.permute.xlu2 %73  }
  0x7c   :  { %v14_v22 = vpop.permute.xlu0 %13   ;;  %v26_v23 = vpop.permute.xlu1 %25  }
  0x7d   :  { %16 = vst.msk [vmem:[#allocation0] sm:$0x1] %vm15_vm2, %v14_v22   ;;  %v92_v24 = vpop.permute.xlu2 %91  }
  0x7e   :  { %22 = vst.msk [vmem:[#allocation0] sm:$0x1] %vm21_vm3, %v20_v20  }
  0x7f   :  { %28 = vst.msk [vmem:[#allocation0] sm:$0x1] %vm27_vm4, %v26_v23  }
  0x80   :  { %34 = vst.msk [vmem:[#allocation0] sm:$0x1] %vm33_vm5, %v32_v16  }
  0x81   :  { %40 = vst.msk [vmem:[#allocation0] sm:$0x1] %vm39_vm6, %v38_v17  }
  0x84   :  { %v44_v25 = vpop.permute.xlu0 %43   ;;  %v50_v26 = vpop.permute.xlu1 %49  }
  0x85   :  { %46 = vst.msk [vmem:[#allocation0] sm:$0x1] %vm45_vm7, %v44_v25  }
  0x86   :  { %52 = vst.msk [vmem:[#allocation0] sm:$0x1] %vm51_vm8, %v50_v26  }
  0x87   :  { %58 = vst.msk [vmem:[#allocation0] sm:$0x1] %vm57_vm9, %v56_v18  }
  0x8c   :  { %v62_v27 = vpop.permute.xlu0 %61   ;;  %v68_v28 = vpop.permute.xlu1 %67  }
  0x8d   :  { %64 = vst.msk [vmem:[#allocation0] sm:$0x1] %vm63_vm10, %v62_v27  }
  0x8e   :  { %70 = vst.msk [vmem:[#allocation0] sm:$0x1] %vm69_vm11, %v68_v28  }
  0x8f   :  { %76 = vst.msk [vmem:[#allocation0] sm:$0x1] %vm75_vm12, %v74_v21  }
  0x94   :  { %v80_v29 = vpop.permute.xlu0 %79   ;;  %v86_v30 = vpop.permute.xlu1 %85  }
  0x95   :  { %82 = vst.msk [vmem:[#allocation0] sm:$0x1] %vm81_vm13, %v80_v29  }
  0x96   :  { %88 = vst.msk [vmem:[#allocation0] sm:$0x1] %vm87_vm14, %v86_v30  }
  0x97   :  { %94 = vst.msk [vmem:[#allocation0] sm:$0x1] %vm93_vm15, %v92_v24  }
  0x9e   :  { %v97_v31 = vld [vmem:[#allocation0] sm:$0x1] }
  0x9f   :  { %100 = vst [vmem:[%s208_s1] sm:$0x1] %v97_v31 }

// kernel: custom_block_forward.1
= control target key start
LH: loop header
LB: loop body
LE: loop exit
PB: predicated region body
PF: predicated region fallthrough
CT: control target
= control target key end

     0   :  { %vm26_vm0 = vcmask 516096   ;;  %v983_v2 = vmov 0.0   ;;  %vm31_vm1 = vcmask 523264   ;;  %vm303_vm2 = vcmask 130048   ;;  %s1758_s1 = inlined_call_operand.vmem [shape: f32[3,64,128], index: 1, kind: input, shape index: {}]   ;;  %s1759_s0 = inlined_call_operand.vmem [shape: f32[2,16,64], index: 0, kind: input, shape index: {}]   ;;  %s1760_s2 = inlined_call_operand.vmem [shape: f32[1,128], index: 2, kind: input, shape index: {}]   ;;  %s1761_s3 = inlined_call_operand.vmem [shape: f32[3,128,128], index: 3, kind: input, shape index: {}]   ;;  %s1762_s4 = inlined_call_operand.vmem [shape: f32[1,128], index: 4, kind: input, shape index: {}]   ;;  %s1763_s6 = inlined_call_operand.vmem [shape: f32[2,128,64], index: 6, kind: input, shape index: {}]   ;;  %s1764_s5 = inlined_call_operand.vmem [shape: f32[2,8,16], index: 5, kind: input, shape index: {}]   ;;  %s1765_s7 = inlined_call_operand.vmem [shape: f32[2,8,64], index: 7, kind: output, shape index: {}]  }
   0x1   :  { %v1027_v0 = vld [vmem:[%s1758_s1 + $0x78] sm:$0xff]  ;;  %v1032_v1 = vld [vmem:[%s1758_s1 + $0x70] sm:$0xff]  ;;  %27 = vst.msk [vmem:[#allocation2] sm:$0x1] %vm26_vm0, %v983_v2  ;;  %v1040_v3 = vld [vmem:[%s1758_s1 + $0x68] sm:$0xff] }
   0x2   :  { %69 = vmatpush.msra.mxu0 %v1027_v0  ;;  %28 = vst.msk [vmem:[#allocation2 + $0x11] sm:$0x1] %vm26_vm0, %v983_v2  ;;  %v1045_v4 = vld [vmem:[%s1758_s1 + $0xb8] sm:$0xff]  ;;  %v1052_v5 = vld [vmem:[%s1758_s1 + $0xb0] sm:$0xff]  ;;  %v29_v6 = vld [vmem:[%s1759_s0] sm:$0xff] }
   0x3   :  { %163 = vst [vmem:[#allocation3] sm:$0x1] %v983_v2  ;;  %138 = vmatpush.msra.mxu2 %v1045_v4  ;;  %v1060_v7 = vld [vmem:[%s1758_s1 + $0x60] sm:$0xff]  ;;  %v1066_v8 = vld [vmem:[%s1758_s1 + $0xa8] sm:$0xff]  ;;  %v1074_v9 = vld [vmem:[%s1758_s1 + $0x58] sm:$0xff] }
   0x4   :  { %70 = vmatpush.msra.mxu0 %v1032_v1  ;;  %164 = vst [vmem:[#allocation3 + $0x11] sm:$0x1] %v983_v2  ;;  %v1079_v10 = vld [vmem:[%s1758_s1 + $0xa0] sm:$0xff]  ;;  %v30_v11 = vld [vmem:[%s1759_s0 + $0x8] sm:$0xff]  ;;  %v1091_v12 = vld [vmem:[%s1758_s1 + $0x50] sm:$0xff] }
   0x5   :  { %32 = vst.msk [vmem:[#allocation2 + $0x1] sm:$0xff] %vm31_vm1, %v29_v6  ;;  %139 = vmatpush.msra.mxu2 %v1052_v5  ;;  %v1096_v13 = vld [vmem:[%s1758_s1 + $0x98] sm:$0xff]  ;;  %v1103_v14 = vld [vmem:[%s1758_s1 + $0x48] sm:$0xff]  ;;  %v1108_v15 = vld [vmem:[%s1758_s1 + $0x90] sm:$0xff] }
   0x6   :  { %71 = vmatpush.msra.mxu0 %v1040_v3  ;;  %429 = vst.msk [vmem:[#allocation2 + $0x18] sm:$0x1] %vm26_vm0, %v983_v2  ;;  %v1115_v16 = vld [vmem:[%s1758_s1 + $0x40] sm:$0xff]  ;;  %v1120_v17 = vld [vmem:[%s1758_s1 + $0x88] sm:$0xff]  ;;  %v1127_v19 = vld [vmem:[%s1758_s1 + $0x38] sm:$0xff] }
   0x7   :  { %430 = vst.msk [vmem:[#allocation2 + $0x29] sm:$0x1] %vm26_vm0, %v983_v2  ;;  %140 = vmatpush.msra.mxu2 %v1066_v8  ;;  %v1132_v20 = vld [vmem:[%s1758_s1 + $0x80] sm:$0xff]  ;;  %v1140_v22 = vld [vmem:[%s1758_s1 + $0x30] sm:$0xff]  ;;  %v1147_v23 = vld [vmem:[%s1758_s1 + $0x28] sm:$0xff] }
   0x8   :  { %72 = vmatpush.msra.mxu0 %v1060_v7  ;;  %33 = vst.msk [vmem:[#allocation2 + $0x9] sm:$0xff] %vm31_vm1, %v30_v11  ;;  %v1154_v24 = vld [vmem:[%s1758_s1 + $0x20] sm:$0xff]  ;;  %v1160_v26 = vld [vmem:[%s1758_s1 + $0x18] sm:$0xff]  ;;  %v1167_v28 = vld [vmem:[%s1758_s1 + $0x10] sm:$0xff] }
   0x9   :  { %564 = vst [vmem:[#allocation3 + $0x18] sm:$0x1] %v983_v2  ;;  %141 = vmatpush.msra.mxu2 %v1079_v10  ;;  %v1173_v29 = vld [vmem:[%s1758_s1 + $0x8] sm:$0xff]  ;;  %v1180_v30 = vld [vmem:[%s1758_s1] sm:$0xff]  ;;  %v1189_v33 = vld [vmem:[%s1761_s3 + $0xf8] sm:$0xff] }
   0xa   :  { %73 = vmatpush.msra.mxu0 %v1074_v9  ;;  %565 = vst [vmem:[#allocation3 + $0x29] sm:$0x1] %v983_v2  ;;  %204 = vmatpush.msra.mxu3 %v1189_v33  ;;  %v1195_v34 = vld [vmem:[%s1761_s3 + $0xf0] sm:$0xff]  ;;  %v1201_v35 = vld [vmem:[%s1761_s3 + $0xe8] sm:$0xff]  ;;  %v1207_v36 = vld [vmem:[%s1761_s3 + $0xe0] sm:$0xff] }
   0xb   :  { %142 = vmatpush.msra.mxu2 %v1096_v13  ;;  %v1212_v37 = vld [vmem:[%s1761_s3 + $0x78] sm:$0xff]  ;;  %v1217_v38 = vld [vmem:[%s1761_s3 + $0x70] sm:$0xff]  ;;  %v1229_v40 = vld [vmem:[%s1761_s3 + $0x68] sm:$0xff] }
   0xc   :  { %74 = vmatpush.msra.mxu0 %v1091_v12  ;;  %v44_v18 = vld [vmem:[#allocation2 + $0x1] sm:$0xff]  ;;  %205 = vmatpush.msra.mxu3 %v1195_v34  ;;  %v1224_v39 = vld [vmem:[%s1761_s3 + $0xd8] sm:$0xff]  ;;  %v1236_v41 = vld [vmem:[%s1761_s3 + $0xd0] sm:$0xff] }
   0xd   :  { %143 = vmatpush.msra.mxu2 %v1108_v15  ;;  %v34_v31 = vld [vmem:[#allocation2] sm:$0xff]  ;;  %v1243_v42 = vld [vmem:[%s1761_s3 + $0xc8] sm:$0xff]  ;;  %v1260_v45 = vld [vmem:[%s1761_s3 + $0x58] sm:$0xff] }
   0xe   :  { %75 = vmatpush.msra.mxu0 %v1103_v14  ;;  %206 = vmatpush.msra.mxu3 %v1201_v35  ;;  %v1249_v43 = vld [vmem:[%s1761_s3 + $0x60] sm:$0xff]  ;;  %v1265_v46 = vld [vmem:[%s1761_s3 + $0x178] sm:$0xff]  ;;  %v1272_v47 = vld [vmem:[%s1761_s3 + $0x50] sm:$0xff] }
   0xf   :  { %144 = vmatpush.msra.mxu2 %v1120_v17  ;;  %v113_v21 = vld [vmem:[#allocation2 + $0x2] sm:$0xff]  ;;  %v114_v27 = vld [vmem:[#allocation2 + $0xa] sm:$0xff]  ;;  %269 = vmatpush.msra.mxu1 %v1265_v46  ;;  %v1288_v50 = vld [vmem:[%s1761_s3 + $0xb8] sm:$0xff] }
  0x10   :  { %76 = vmatpush.msra.mxu0 %v1115_v16  ;;  %v45_v25 = vld [vmem:[#allocation2 + $0x9] sm:$0xff]  ;;  %207 = vmatpush.msra.mxu3 %v1207_v36  ;;  %v1254_v44 = vld [vmem:[%s1761_s3 + $0xc0] sm:$0xff]  ;;  %v1332_v57 = vld [vmem:[%s1761_s3 + $0x38] sm:$0xff] }
  0x11   :  { %837 = vmatmul.msk.f32.vlgmr.msra.gmra.mxu0 %vm31_vm1, %v44_v18  ;;  %145 = vmatpush.msra.mxu2 %v1132_v20  ;;  %v35_v32 = vld [vmem:[#allocation2 + $0x8] sm:$0xff]  ;;  %v1277_v48 = vld [vmem:[%s1761_s3 + $0x170] sm:$0xff]  ;;  %v1314_v54 = vld [vmem:[%s1761_s3 + $0x40] sm:$0xff] }
  0x12   :  { %98 = vmatpush.msrb.mxu0 %v1127_v19  ;;  %849 = vmatmul.msk.f32.vlgmr.msra.gmra.mxu2 %vm31_vm1, %v113_v21  ;;  %v1283_v49 = vld [vmem:[%s1761_s3 + $0x168] sm:$0xff]  ;;  %v1300_v52 = vld [vmem:[%s1761_s3 + $0xb0] sm:$0xff]  ;;  %v1319_v55 = vld [vmem:[%s1761_s3 + $0x160] sm:$0xff] }
  0x13   :  { %208 = vmatpush.msra.mxu3 %v1224_v39  ;;  %270 = vmatpush.msra.mxu1 %v1277_v48  ;;  %v1294_v51 = vld [vmem:[%s1761_s3 + $0x48] sm:$0xff]  ;;  %v1325_v56 = vld [vmem:[%s1761_s3 + $0xa0] sm:$0xff]  ;;  %v1337_v58 = vld [vmem:[%s1761_s3 + $0x158] sm:$0xff] }
  0x14   :  { %99 = vmatpush.msrb.mxu0 %v1140_v22  ;;  %v1308_v53 = vld [vmem:[%s1761_s3 + $0xa8] sm:$0xff]  ;;  %v1343_v59 = vld [vmem:[%s1761_s3 + $0x98] sm:$0xff]  ;;  %v1350_v60 = vld [vmem:[%s1761_s3 + $0x30] sm:$0xff] }
  0x15   :  { %209 = vmatpush.msra.mxu3 %v1236_v41  ;;  %271 = vmatpush.msra.mxu1 %v1283_v49  ;;  %v1355_v61 = vld [vmem:[%s1761_s3 + $0x150] sm:$0xff]  ;;  %v1368_v63 = vld [vmem:[%s1761_s3 + $0x28] sm:$0xff]  ;;  %v1386_v11 = vld [vmem:[%s1761_s3 + $0x20] sm:$0xff] }
  0x16   :  { %100 = vmatpush.msrb.mxu0 %v1147_v23  ;;  %v1363_v62 = vld [vmem:[%s1761_s3 + $0x90] sm:$0xff]  ;;  %1776 = vst [vmem:[#allocation4_spill] sm:$0xff] %v1368_v63  ;;  %v1373_v2 = vld [vmem:[%s1761_s3 + $0x148] sm:$0xff]  ;;  %v1391_v18 = vld [vmem:[%s1761_s3 + $0x140] sm:$0xff] }
  0x17   :  { %210 = vmatpush.msra.mxu3 %v1243_v42  ;;  %272 = vmatpush.msra.mxu1 %v1319_v55  ;;  %v1379_v6 = vld [vmem:[%s1761_s3 + $0x88] sm:$0xff]  ;;  %1777 = vst [vmem:[#allocation5_spill] sm:$0xff] %v1386_v11  ;;  %v1397_v21 = vld [vmem:[%s1761_s3 + $0x80] sm:$0xff] }
  0x18   :  { %101 = vmatpush.msrb.mxu0 %v1154_v24 }
  0x19   :  { %838 = vmatmul.msk.f32.gmra.mxu0 %vm31_vm1, %v45_v25  ;;  %211 = vmatpush.msra.mxu3 %v1254_v44  ;;  %v1404_v25 = vld [vmem:[%s1761_s3 + $0x18] sm:$0xff] }
  0x1a   :  { %102 = vmatpush.msrb.mxu0 %v1160_v26  ;;  %850 = vmatmul.msk.f32.gmra.mxu2 %vm31_vm1, %v114_v27  ;;  %1778 = vst [vmem:[#allocation6_spill] sm:$0xff] %v1404_v25  ;;  %v1409_v27 = vld [vmem:[%s1761_s3 + $0x138] sm:$0xff] }
  0x1b   :  { %212 = vmatpush.msra.mxu3 %v1288_v50  ;;  %273 = vmatpush.msra.mxu1 %v1337_v58 }
  0x1c   :  { %103 = vmatpush.msrb.mxu0 %v1167_v28 }
  0x1d   :  { %213 = vmatpush.msra.mxu3 %v1300_v52  ;;  %274 = vmatpush.msra.mxu1 %v1355_v61 }
  0x1e   :  { %104 = vmatpush.msrb.mxu0 %v1173_v29 }
  0x1f   :  { %214 = vmatpush.msra.mxu3 %v1308_v53  ;;  %275 = vmatpush.msra.mxu1 %v1373_v2 }
  0x20   :  { %105 = vmatpush.msrb.mxu0 %v1180_v30 }
  0x21   :  { %839 = vmatmul.msk.f32.vlgmr.msrb.gmra.mxu0 %vm31_vm1, %v34_v31  ;;  %215 = vmatpush.msra.mxu3 %v1325_v56  ;;  %v1417_v31 = vld [vmem:[%s1761_s3 + $0x10] sm:$0xff] }
  0x22   :  { %227 = vmatpush.msra.mxu0 %v1212_v37  ;;  %276 = vmatpush.msra.mxu1 %v1391_v18  ;;  %1779 = vst [vmem:[#allocation7_spill] sm:$0xff] %v1417_v31 }
  0x23   :  { %216 = vmatpush.msra.mxu3 %v1343_v59 }
  0x24   :  { %228 = vmatpush.msra.mxu0 %v1217_v38  ;;  %277 = vmatpush.msra.mxu1 %v1409_v27 }
  0x25   :  { %217 = vmatpush.msra.mxu3 %v1363_v62 }
  0x26   :  { %229 = vmatpush.msra.mxu0 %v1229_v40 }
  0x27   :  { %218 = vmatpush.msra.mxu3 %v1379_v6 }
  0x28   :  { %230 = vmatpush.msra.mxu0 %v1249_v43 }
  0x29   :  { %840 = vmatmul.msk.f32.gmra.mxu0 %vm31_vm1, %v35_v32  ;;  %219 = vmatpush.msra.mxu3 %v1397_v21  ;;  %v1422_v32 = vld [vmem:[%s1761_s3 + $0x130] sm:$0xff] }
  0x2a   :  { %231 = vmatpush.msra.mxu0 %v1260_v45  ;;  %1780 = vst [vmem:[#allocation8_spill] sm:$0xff] %v1422_v32  ;;  %278 = vmatpush.msra.mxu1 %v1422_v32 }
  0x2c   :  { %232 = vmatpush.msra.mxu0 %v1272_v47 }
  0x2e   :  { %233 = vmatpush.msra.mxu0 %v1294_v51 }
  0x30   :  { %234 = vmatpush.msra.mxu0 %v1314_v54 }
  0x32   :  { %235 = vmatpush.msra.mxu0 %v1332_v57 }
  0x34   :  { %236 = vmatpush.msra.mxu0 %v1350_v60 }
  0x36   :  { %237 = vmatpush.msra.mxu0 %v1368_v63  ;;  %v1446_v63 = vld [vmem:[%s1761_s3 + $0x120] sm:$0xff] }
  0x37   :  { %1784 = vst [vmem:[#allocation12_spill] sm:$0xff] %v1446_v63 }
  0x38   :  { %238 = vmatpush.msra.mxu0 %v1386_v11  ;;  %v1434_v11 = vld [vmem:[%s1761_s3 + $0x128] sm:$0xff] }
  0x39   :  { %1782 = vst [vmem:[#allocation10_spill] sm:$0xff] %v1434_v11  ;;  %279 = vmatpush.msra.mxu1 %v1434_v11  ;;  %v1458_v11 = vld [vmem:[%s1761_s3 + $0x110] sm:$0xff] }
  0x3a   :  { %239 = vmatpush.msra.mxu0 %v1404_v25  ;;  %v1429_v25 = vld [vmem:[%s1761_s3 + $0x8] sm:$0xff] }
  0x3b   :  { %1781 = vst [vmem:[#allocation9_spill] sm:$0xff] %v1429_v25  ;;  %280 = vmatpush.msra.mxu1 %v1446_v63  ;;  %v1472_v63 = vld [vmem:[%s1761_s3 + $0x100] sm:$0xff] }
  0x3c   :  { %240 = vmatpush.msra.mxu0 %v1417_v31  ;;  %v1441_v31 = vld [vmem:[%s1761_s3] sm:$0xff]  ;;  %1785 = vst [vmem:[#allocation13_spill] sm:$0xff] %v1472_v63 }
  0x3d   :  { %1783 = vst [vmem:[#allocation11_spill] sm:$0xff] %v1441_v31 }
  0x3e   :  { %241 = vmatpush.msra.mxu0 %v1429_v25  ;;  %v1453_v25 = vld [vmem:[%s1761_s3 + $0x118] sm:$0xff] }
  0x3f   :  { %281 = vmatpush.msra.mxu1 %v1453_v25 }
  0x40   :  { %242 = vmatpush.msra.mxu0 %v1441_v31  ;;  %v1465_v31 = vld [vmem:[%s1761_s3 + $0x108] sm:$0xff] }
  0x41   :  { %282 = vmatpush.msra.mxu1 %v1458_v11 }
  0x42   :  { %470 = vmatpush.msrb.mxu0 %v1027_v0 }
  0x43   :  { %283 = vmatpush.msra.mxu1 %v1465_v31 }
  0x44   :  { %471 = vmatpush.msrb.mxu0 %v1032_v1 }
  0x45   :  { %284 = vmatpush.msra.mxu1 %v1472_v63 }
  0x46   :  { %472 = vmatpush.msrb.mxu0 %v1040_v3 }
  0x47   :  { %499 = vmatpush.msrb.mxu1 %v1127_v19 }
  0x48   :  { %473 = vmatpush.msrb.mxu0 %v1060_v7 }
  0x49   :  { %500 = vmatpush.msrb.mxu1 %v1140_v22 }
  0x4a   :  { %474 = vmatpush.msrb.mxu0 %v1074_v9  ;;  %v979_v9 = vld [vmem:[%s1760_s2] ss:$0 sm:$0xff] }
  0x4b   :  { %501 = vmatpush.msrb.mxu1 %v1147_v23 }
  0x4c   :  { %475 = vmatpush.msrb.mxu0 %v1091_v12  ;;  %v902_v12 = vld [vmem:[%s1759_s0 + $0x10] sm:$0xff] }
  0x4d   :  { %502 = vmatpush.msrb.mxu1 %v1154_v24  ;;  %434 = vst.msk [vmem:[#allocation2 + $0x19] sm:$0xff] %vm31_vm1, %v902_v12  ;;  %v1562_v12 = vld [vmem:[%s1763_s6 + $0xf8] sm:$0xff] }
  0x4e   :  { %476 = vmatpush.msrb.mxu0 %v1103_v14 }
  0x4f   :  { %503 = vmatpush.msrb.mxu1 %v1160_v26 }
  0x50   :  { %477 = vmatpush.msrb.mxu0 %v1115_v16 }
  0x51   :  { %504 = vmatpush.msrb.mxu1 %v1167_v28 }
  0x53   :  { %505 = vmatpush.msrb.mxu1 %v1173_v29 }
  0x55   :  { %506 = vmatpush.msrb.mxu1 %v1180_v30  ;;  %v446_v30 = vld [vmem:[#allocation2 + $0x19] sm:$0xff] }
  0x8e   :  { %v78_v32 = vpop.f32.mrf.mxu0 }
  0x95   :  { %v147_v1 = vpop.f32.mrf.mxu2 }
  0x96   :  { %v81_v0 = vpop.f32.mrf.mxu0 }
  0x9d   :  { %v150_v23 = vpop.f32.mrf.mxu2 }
  0x9e   :  { %v107_v3 = vpop.f32.mrf.mxu0 }
  0x9f   :  { %v108_v7 = vadd.f32 %v107_v3, %v78_v32 }
  0xa1   :  { %v153_v14 = vadd.f32 %v147_v1, %v108_v7 }
  0xa3   :  { %v159_v16 = vadd.f32 %v979_v9, %v153_v14  ;;  %v1567_v14 = vld [vmem:[%s1763_s6 + $0xf0] sm:$0xff] }
  0xa5   :  { %v161_v19 = vmax.f32 %v159_v16, 0.0  ;;  %v1573_v16 = vld [vmem:[%s1764_s5 + $0x8] sm:$0xff] }
  0xa6   :  { %v110_v22 = vpop.f32.mrf.mxu0 }
  0xa7   :  { %165 = vst [vmem:[#allocation3 + $0x1] sm:$0xff] %v161_v19  ;;  %v111_v24 = vadd.f32 %v110_v22, %v81_v0  ;;  %220 = vmatmul.f32.vlgmr.msra.gmra.mxu3 %v161_v19  ;;  %v1579_v19 = vld [vmem:[%s1763_s6 + $0xe8] sm:$0xff]  ;;  %v1586_v22 = vld [vmem:[%s1763_s6 + $0xe0] sm:$0xff] }
  0xa9   :  { %v154_v32 = vadd.f32 %v150_v23, %v111_v24  ;;  %v1592_v23 = vld [vmem:[%s1763_s6 + $0xd8] sm:$0xff]  ;;  %v1598_v24 = vld [vmem:[%s1763_s6 + $0xd0] sm:$0xff] }
  0xab   :  { %v160_v3 = vadd.f32 %v979_v9, %v154_v32  ;;  %v1555_v9 = vld [vmem:[%s1764_s5] sm:$0xff]  ;;  %v362_v32 = vld [vmem:[%s1763_s6 + $0x48] sm:$0xff] }
  0xad   :  { %v162_v63 = vmax.f32 %v160_v3, 0.0  ;;  %v1608_v3 = vld [vmem:[%s1763_s6 + $0xc8] sm:$0xff] }
  0xae   :  { %v167_v26 = vld [vmem:[#allocation3] sm:$0xff] }
  0xaf   :  { %166 = vst [vmem:[#allocation3 + $0x9] sm:$0xff] %v162_v63  ;;  %243 = vmatmul.f32.vlgmr.msra.gmra.mxu0 %v167_v26  ;;  %223 = vmatmul.f32.gmra.mxu3 %v162_v63  ;;  %v361_v26 = vld [vmem:[%s1763_s6 + $0x40] sm:$0xff] }
  0xb0   :  { %538 = vmatpush.msra.mxu0 %v1045_v4 }
  0xb2   :  { %539 = vmatpush.msra.mxu0 %v1052_v5  ;;  %v903_v5 = vld [vmem:[%s1759_s0 + $0x18] sm:$0xff] }
  0xb3   :  { %435 = vst.msk [vmem:[#allocation2 + $0x21] sm:$0xff] %vm31_vm1, %v903_v5  ;;  %v1634_v5 = vld [vmem:[%s1763_s6 + $0xb0] sm:$0xff] }
  0xb4   :  { %540 = vmatpush.msra.mxu0 %v1066_v8 }
  0xb6   :  { %v168_v28 = vld [vmem:[#allocation3 + $0x8] sm:$0xff]  ;;  %541 = vmatpush.msra.mxu0 %v1079_v10 }
  0xb7   :  { %v250_v29 = vld [vmem:[#allocation3 + $0x2] sm:$0xff]  ;;  %246 = vmatmul.f32.gmra.mxu0 %v168_v28  ;;  %v251_v4 = vld [vmem:[#allocation3 + $0xa] sm:$0xff] }
  0xb8   :  { %285 = vmatmul.f32.vlgmr.msra.gmra.mxu1 %v250_v29  ;;  %542 = vmatpush.msra.mxu0 %v1096_v13  ;;  %v436_v10 = vld [vmem:[#allocation2 + $0x18] sm:$0xff]  ;;  %v1617_v28 = vld [vmem:[%s1763_s6 + $0xc0] sm:$0xff] }
  0xb9   :  { %604 = vmatpush.msra.mxu1 %v1189_v33  ;;  %v368_v33 = vld [vmem:[%s1763_s6 + $0x78] sm:$0xff] }
  0xba   :  { %543 = vmatpush.msra.mxu0 %v1108_v15  ;;  %v447_v8 = vld [vmem:[#allocation2 + $0x21] sm:$0xff]  ;;  %369 = vmatpush.msrb.mxu3 %v368_v33  ;;  %v360_v29 = vld [vmem:[%s1763_s6 + $0x38] sm:$0xff] }
  0xbb   :  { %605 = vmatpush.msra.mxu1 %v1195_v34  ;;  %v514_v13 = vld [vmem:[#allocation2 + $0x1a] sm:$0xff]  ;;  %v367_v34 = vld [vmem:[%s1763_s6 + $0x70] sm:$0xff] }
  0xbc   :  { %544 = vmatpush.msra.mxu0 %v1120_v17  ;;  %v437_v15 = vld [vmem:[#allocation2 + $0x20] sm:$0xff]  ;;  %370 = vmatpush.msrb.mxu3 %v367_v34 }
  0xbd   :  { %606 = vmatpush.msra.mxu1 %v1201_v35  ;;  %v515_v17 = vld [vmem:[#allocation2 + $0x22] sm:$0xff] }
  0xbe   :  { %545 = vmatpush.msra.mxu0 %v1132_v20 }
  0xbf   :  { %607 = vmatpush.msra.mxu1 %v1207_v36  ;;  %912 = vmatmul.msk.f32.vlgmr.msrb.gmra.mxu0 %vm31_vm1, %v446_v30  ;;  %v366_v36 = vld [vmem:[%s1763_s6 + $0x68] sm:$0xff]  ;;  %v1625_v30 = vld [vmem:[%s1763_s6 + $0xb8] sm:$0xff] }
  0xc0   :  { %288 = vmatmul.f32.gmra.mxu1 %v251_v4  ;;  %371 = vmatpush.msrb.mxu3 %v366_v36  ;;  %v359_v4 = vld [vmem:[%s1763_s6 + $0x30] sm:$0xff] }
  0xc1   :  { %608 = vmatpush.msra.mxu1 %v1224_v39  ;;  %v365_v39 = vld [vmem:[%s1763_s6 + $0x60] sm:$0xff] }
  0xc2   :  { %372 = vmatpush.msrb.mxu3 %v365_v39 }
  0xc3   :  { %609 = vmatpush.msra.mxu1 %v1236_v41 }
  0xc5   :  { %610 = vmatpush.msra.mxu1 %v1243_v42  ;;  %v364_v42 = vld [vmem:[%s1763_s6 + $0x58] sm:$0xff] }
  0xc6   :  { %373 = vmatpush.msrb.mxu3 %v364_v42 }
  0xc7   :  { %611 = vmatpush.msra.mxu1 %v1254_v44  ;;  %913 = vmatmul.msk.f32.gmra.mxu0 %vm31_vm1, %v447_v8  ;;  %v363_v44 = vld [vmem:[%s1763_s6 + $0x50] sm:$0xff]  ;;  %v358_v8 = vld [vmem:[%s1763_s6 + $0x28] sm:$0xff] }
  0xc8   :  { %914 = vmatmul.msk.f32.vlgmr.msrb.gmra.mxu1 %vm31_vm1, %v436_v10  ;;  %374 = vmatpush.msrb.mxu3 %v363_v44  ;;  %v1644_v10 = vld [vmem:[%s1763_s6 + $0xa8] sm:$0xff] }
  0xc9   :  { %612 = vmatpush.msra.mxu1 %v1288_v50 }
  0xca   :  { %375 = vmatpush.msrb.mxu3 %v362_v32 }
  0xcb   :  { %613 = vmatpush.msra.mxu1 %v1300_v52 }
  0xcc   :  { %376 = vmatpush.msrb.mxu3 %v361_v26 }
  0xcd   :  { %614 = vmatpush.msra.mxu1 %v1308_v53 }
  0xce   :  { %377 = vmatpush.msrb.mxu3 %v360_v29 }
  0xcf   :  { %615 = vmatpush.msra.mxu1 %v1325_v56  ;;  %924 = vmatmul.msk.f32.vlgmr.msra.gmra.mxu0 %vm31_vm1, %v514_v13  ;;  %v357_v13 = vld [vmem:[%s1763_s6 + $0x20] sm:$0xff] }
  0xd0   :  { %915 = vmatmul.msk.f32.gmra.mxu1 %vm31_vm1, %v437_v15  ;;  %378 = vmatpush.msrb.mxu3 %v359_v4  ;;  %v1653_v15 = vld [vmem:[%s1763_s6 + $0xa0] sm:$0xff] }
  0xd1   :  { %616 = vmatpush.msra.mxu1 %v1343_v59 }
  0xd2   :  { %379 = vmatpush.msrb.mxu3 %v358_v8 }
  0xd3   :  { %617 = vmatpush.msra.mxu1 %v1363_v62  ;;  %v980_v62 = vld [vmem:[%s1762_s4] ss:$0 sm:$0xff] }
  0xd4   :  { %380 = vmatpush.msrb.mxu3 %v357_v13 }
  0xd5   :  { %618 = vmatpush.msra.mxu1 %v1379_v6 }
  0xd7   :  { %619 = vmatpush.msra.mxu1 %v1397_v21  ;;  %925 = vmatmul.msk.f32.gmra.mxu0 %vm31_vm1, %v515_v17  ;;  %v356_v17 = vld [vmem:[%s1763_s6 + $0x18] sm:$0xff] }
  0xd8   :  { %381 = vmatpush.msrb.mxu3 %v356_v17 }
  0xd9   :  { %766 = vmatpush.msrb.mxu1 %v368_v33  ;;  %v355_v33 = vld [vmem:[%s1763_s6 + $0x10] sm:$0xff] }
  0xda   :  { %382 = vmatpush.msrb.mxu3 %v355_v33 }
  0xdb   :  { %767 = vmatpush.msrb.mxu1 %v367_v34  ;;  %v1670_v34 = vld [vmem:[%s1763_s6 + $0x90] sm:$0xff] }
  0xdd   :  { %768 = vmatpush.msrb.mxu1 %v366_v36  ;;  %v354_v36 = vld [vmem:[%s1763_s6 + $0x8] sm:$0xff] }
  0xde   :  { %383 = vmatpush.msrb.mxu3 %v354_v36 }
  0xdf   :  { %769 = vmatpush.msrb.mxu1 %v365_v39  ;;  %v1680_v39 = vld [vmem:[%s1763_s6 + $0x88] sm:$0xff] }
  0xe1   :  { %770 = vmatpush.msrb.mxu1 %v364_v42  ;;  %v1689_v42 = vld [vmem:[%s1763_s6 + $0x80] sm:$0xff] }
  0xe3   :  { %771 = vmatpush.msrb.mxu1 %v363_v44 }
  0xe5   :  { %772 = vmatpush.msrb.mxu1 %v362_v32  ;;  %v982_v32 = vld [vmem:[%s1762_s4] ss:$0 sm:$0xff] }
  0xe7   :  { %773 = vmatpush.msrb.mxu1 %v361_v26 }
  0xe9   :  { %774 = vmatpush.msrb.mxu1 %v360_v29 }
  0xeb   :  { %775 = vmatpush.msrb.mxu1 %v359_v4 }
  0xed   :  { %776 = vmatpush.msrb.mxu1 %v358_v8 }
  0xef   :  { %777 = vmatpush.msrb.mxu1 %v357_v13 }
  0xf1   :  { %778 = vmatpush.msrb.mxu1 %v356_v17 }
  0xf3   :  { %779 = vmatpush.msrb.mxu1 %v355_v33 }
  0xf5   :  { %780 = vmatpush.msrb.mxu1 %v354_v36 }
 0x12a   :  { %v221_v35 = vpop.f32.mrf.mxu3 }
 0x12c   :  { %v244_v20 = vpop.f32.mrf.mxu0 }
 0x12d   :  { %v245_v52 = vadd.f32 %v244_v20, %v221_v35  ;;  %v1661_v20 = vld [vmem:[%s1763_s6 + $0x98] sm:$0xff] }
 0x132   :  { %v224_v53 = vpop.f32.mrf.mxu3 }
 0x134   :  { %v247_v50 = vpop.f32.mrf.mxu0 }
 0x135   :  { %v286_v41 = vpop.f32.mrf.mxu1  ;;  %v248_v59 = vadd.f32 %v247_v50, %v224_v53  ;;  %v1794_v53 = vld [vmem:[#allocation11_spill] sm:$0xff] }
 0x136   :  { %v292_v56 = vadd.f32 %v286_v41, %v245_v52  ;;  %v353_v41 = vld [vmem:[%s1763_s6] sm:$0xff]  ;;  %v1793_v52 = vld [vmem:[#allocation9_spill] sm:$0xff] }
 0x137   :  { %384 = vmatpush.msrb.mxu3 %v353_v41  ;;  %781 = vmatpush.msrb.mxu1 %v353_v41 }
 0x138   :  { %v298_v0 = vadd.f32 %v980_v62, %v292_v56  ;;  %v1795_v56 = vld [vmem:[#allocation13_spill] sm:$0xff] }
 0x139   :  { %627 = vmatpush.msra.mxu3 %v1212_v37 }
 0x13a   :  { %v300_v7 = vmax.f32 %v298_v0, 0.0 }
 0x13b   :  { %628 = vmatpush.msra.mxu3 %v1217_v38  ;;  %v981_v38 = vld [vmem:[%s1760_s2] ss:$0 sm:$0xff] }
 0x13c   :  { %v479_v35 = vpop.f32.mrf.mxu0 }
 0x13d   :  { %v289_v63 = vpop.f32.mrf.mxu1  ;;  %629 = vmatpush.msra.mxu3 %v1229_v40 }
 0x13e   :  { %v293_v6 = vadd.f32 %v289_v63, %v248_v59 }
 0x13f   :  { %630 = vmatpush.msra.mxu3 %v1249_v43 }
 0x140   :  { %v299_v21 = vadd.f32 %v980_v62, %v293_v6 }
 0x141   :  { %631 = vmatpush.msra.mxu3 %v1260_v45 }
 0x142   :  { %v301_v1 = vmax.f32 %v299_v21, 0.0 }
 0x143   :  { %632 = vmatpush.msra.mxu3 %v1272_v47 }
 0x144   :  { %321 = vmatpush.msrb.mxu2 %v301_v1  ;;  %v482_v44 = vpop.f32.mrf.mxu0 }
 0x145   :  { %v508_v50 = vpop.f32.mrf.mxu1  ;;  %633 = vmatpush.msra.mxu3 %v1294_v51  ;;  %v1787_v51 = vld [vmem:[#allocation4_spill] sm:$0xff] }
 0x146   :  { %322 = vmatpush.msrb.mxu2 %v300_v7  ;;  %v509_v37 = vadd.f32 %v508_v50, %v479_v35 }
 0x147   :  { %883 = vmatmul.msk.f32.vlgmr.msrb.gmra.mxu2 %vm303_vm2, %v1555_v9  ;;  %634 = vmatpush.msra.mxu3 %v1314_v54  ;;  %v1788_v54 = vld [vmem:[#allocation10_spill] sm:$0xff] }
 0x148   :  { %346 = vmatpush.msra.mxu2 %v301_v1 }
 0x149   :  { %635 = vmatpush.msra.mxu3 %v1332_v57 }
 0x14a   :  { %347 = vmatpush.msra.mxu2 %v300_v7 }
 0x14b   :  { %636 = vmatpush.msra.mxu3 %v1350_v60 }
 0x14c   :  { %406 = vmatpush.msrb.mxu2 %v1562_v12  ;;  %v547_v40 = vpop.f32.mrf.mxu0 }
 0x14d   :  { %v553_v43 = vadd.f32 %v547_v40, %v509_v37  ;;  %v511_v45 = vpop.f32.mrf.mxu1  ;;  %637 = vmatpush.msra.mxu3 %v1787_v51 }
 0x14e   :  { %407 = vmatpush.msrb.mxu2 %v1567_v14 }
 0x14f   :  { %885 = vmatmul.msk.f32.vlgmr.msra.gmra.mxu2 %vm303_vm2, %v1573_v16 }
 0x150   :  { %408 = vmatpush.msrb.mxu2 %v1579_v19 }
 0x152   :  { %409 = vmatpush.msrb.mxu2 %v1586_v22 }
 0x154   :  { %410 = vmatpush.msrb.mxu2 %v1592_v23 }
 0x156   :  { %411 = vmatpush.msrb.mxu2 %v1598_v24 }
 0x158   :  { %412 = vmatpush.msrb.mxu2 %v1608_v3 }
 0x15a   :  { %413 = vmatpush.msrb.mxu2 %v1617_v28 }
 0x15c   :  { %414 = vmatpush.msrb.mxu2 %v1625_v30 }
 0x15e   :  { %415 = vmatpush.msrb.mxu2 %v1634_v5 }
 0x160   :  { %416 = vmatpush.msrb.mxu2 %v1644_v10 }
 0x162   :  { %417 = vmatpush.msrb.mxu2 %v1653_v15 }
 0x164   :  { %418 = vmatpush.msrb.mxu2 %v1661_v20 }
 0x166   :  { %419 = vmatpush.msrb.mxu2 %v1670_v34 }
 0x168   :  { %420 = vmatpush.msrb.mxu2 %v1680_v39 }
 0x16a   :  { %421 = vmatpush.msrb.mxu2 %v1689_v42 }
 0x16c   :  { %668 = vmatpush.msra.mxu2 %v1265_v46  ;;  %v559_v46 = vadd.f32 %v981_v38, %v553_v43 }
 0x16e   :  { %669 = vmatpush.msra.mxu2 %v1277_v48  ;;  %v561_v47 = vmax.f32 %v559_v46, 0.0  ;;  %v512_v48 = vadd.f32 %v511_v45, %v482_v44 }
 0x170   :  { %670 = vmatpush.msra.mxu2 %v1283_v49  ;;  %v1786_v49 = vld [vmem:[#allocation8_spill] sm:$0xff]  ;;  %566 = vst [vmem:[#allocation3 + $0x19] sm:$0xff] %v561_v47  ;;  %620 = vmatmul.f32.vlgmr.msra.gmra.mxu1 %v561_v47 }
 0x172   :  { %671 = vmatpush.msra.mxu2 %v1319_v55  ;;  %v550_v55 = vpop.f32.mrf.mxu0 }
 0x174   :  { %672 = vmatpush.msra.mxu2 %v1337_v58  ;;  %v554_v58 = vadd.f32 %v550_v55, %v512_v48 }
 0x176   :  { %673 = vmatpush.msra.mxu2 %v1355_v61  ;;  %v1789_v61 = vld [vmem:[#allocation5_spill] sm:$0xff]  ;;  %v560_v57 = vadd.f32 %v981_v38, %v554_v58 }
 0x177   :  { %638 = vmatpush.msra.mxu3 %v1789_v61 }
 0x178   :  { %674 = vmatpush.msra.mxu2 %v1373_v2  ;;  %v1790_v2 = vld [vmem:[#allocation12_spill] sm:$0xff]  ;;  %v562_v60 = vmax.f32 %v560_v57, 0.0 }
 0x17a   :  { %675 = vmatpush.msra.mxu2 %v1391_v18  ;;  %v1791_v18 = vld [vmem:[#allocation6_spill] sm:$0xff]  ;;  %567 = vst [vmem:[#allocation3 + $0x21] sm:$0xff] %v562_v60  ;;  %623 = vmatmul.f32.gmra.mxu1 %v562_v60 }
 0x17b   :  { %639 = vmatpush.msra.mxu3 %v1791_v18 }
 0x17c   :  { %676 = vmatpush.msra.mxu2 %v1409_v27  ;;  %v1792_v27 = vld [vmem:[#allocation7_spill] sm:$0xff] }
 0x17d   :  { %640 = vmatpush.msra.mxu3 %v1792_v27 }
 0x17e   :  { %677 = vmatpush.msra.mxu2 %v1786_v49 }
 0x17f   :  { %641 = vmatpush.msra.mxu3 %v1793_v52 }
 0x180   :  { %678 = vmatpush.msra.mxu2 %v1788_v54 }
 0x181   :  { %642 = vmatpush.msra.mxu3 %v1794_v53  ;;  %v651_v6 = vld [vmem:[#allocation3 + $0x22] sm:$0xff] }
 0x182   :  { %679 = vmatpush.msra.mxu2 %v1790_v2 }
 0x184   :  { %680 = vmatpush.msra.mxu2 %v1453_v25  ;;  %v650_v25 = vld [vmem:[#allocation3 + $0x1a] sm:$0xff] }
 0x186   :  { %681 = vmatpush.msra.mxu2 %v1458_v11  ;;  %v568_v11 = vld [vmem:[#allocation3 + $0x18] sm:$0xff] }
 0x188   :  { %682 = vmatpush.msra.mxu2 %v1465_v31  ;;  %v569_v31 = vld [vmem:[#allocation3 + $0x20] sm:$0xff] }
 0x18a   :  { %683 = vmatpush.msra.mxu2 %v1795_v56 }
 0x1ca   :  { %v324_v59 = vpop.f32.mrf.mxu2 }
 0x1d2   :  { %v349_v62 = vpop.f32.mrf.mxu2 }
 0x1d3   :  { %v352_v63 = vmax.f32 %v324_v59, %v349_v62 }
 0x1d5   :  { %385 = vmatmul.f32.vlgmr.msrb.gmra.mxu3 %v352_v63  ;;  %422 = vmatmul.f32.vlgmr.msrb.gmra.mxu2 %v352_v63 }
 0x1d6   :  { %802 = vmatpush.msrb.mxu3 %v1562_v12 }
 0x1d8   :  { %803 = vmatpush.msrb.mxu3 %v1567_v14 }
 0x1da   :  { %804 = vmatpush.msrb.mxu3 %v1579_v19 }
 0x1dc   :  { %805 = vmatpush.msrb.mxu3 %v1586_v22 }
 0x1dd   :  { %643 = vmatmul.f32.vlgmr.msra.gmra.mxu3 %v568_v11  ;;  %684 = vmatmul.f32.vlgmr.msra.gmra.mxu2 %v650_v25 }
 0x1de   :  { %806 = vmatpush.msrb.mxu3 %v1592_v23 }
 0x1e0   :  { %807 = vmatpush.msrb.mxu3 %v1598_v24 }
 0x1e2   :  { %808 = vmatpush.msrb.mxu3 %v1608_v3 }
 0x1e4   :  { %809 = vmatpush.msrb.mxu3 %v1617_v28 }
 0x1e5   :  { %646 = vmatmul.f32.gmra.mxu3 %v569_v31  ;;  %687 = vmatmul.f32.gmra.mxu2 %v651_v6 }
 0x1e6   :  { %810 = vmatpush.msrb.mxu3 %v1625_v30 }
 0x1e8   :  { %811 = vmatpush.msrb.mxu3 %v1634_v5 }
 0x1ea   :  { %812 = vmatpush.msrb.mxu3 %v1644_v10 }
 0x1ec   :  { %813 = vmatpush.msrb.mxu3 %v1653_v15 }
 0x1ed   :  { %v621_v7 = vpop.f32.mrf.mxu1 }
 0x1ee   :  { %814 = vmatpush.msrb.mxu3 %v1661_v20 }
 0x1f0   :  { %815 = vmatpush.msrb.mxu3 %v1670_v34 }
 0x1f2   :  { %816 = vmatpush.msrb.mxu3 %v1680_v39 }
 0x1f4   :  { %817 = vmatpush.msrb.mxu3 %v1689_v42 }
 0x1f7   :  { %v624_v22 = vpop.f32.mrf.mxu1 }
 0x258   :  { %v386_v21 = vpop.f32.mrf.mxu3  ;;  %v423_v0 = vpop.f32.mrf.mxu2 }
 0x259   :  { %v426_v1 = vmax.f32 %v386_v21, %v423_v0 }
 0x25b   :  { %427 = vst.msk [vmem:[%s1765_s7] sm:$0xff] %vm31_vm1, %v426_v1 }
 0x260   :  { %v644_v12 = vpop.f32.mrf.mxu3  ;;  %v685_v14 = vpop.f32.mrf.mxu2 }
 0x261   :  { %v645_v19 = vadd.f32 %v644_v12, %v621_v7 }
 0x263   :  { %v691_v24 = vadd.f32 %v685_v14, %v645_v19 }
 0x265   :  { %v697_v29 = vadd.f32 %v982_v32, %v691_v24 }
 0x267   :  { %v699_v5 = vmax.f32 %v697_v29, 0.0 }
 0x268   :  { %v647_v23 = vpop.f32.mrf.mxu3  ;;  %v688_v26 = vpop.f32.mrf.mxu2 }
 0x269   :  { %v648_v3 = vadd.f32 %v647_v23, %v624_v22 }
 0x26b   :  { %v692_v28 = vadd.f32 %v688_v26, %v648_v3 }
 0x26d   :  { %v698_v30 = vadd.f32 %v982_v32, %v692_v28 }
 0x26f   :  { %v700_v4 = vmax.f32 %v698_v30, 0.0 }
 0x271   :  { %719 = vmatpush.msrb.mxu0 %v700_v4 }
 0x273   :  { %720 = vmatpush.msrb.mxu0 %v699_v5 }
 0x274   :  { %958 = vmatmul.msk.f32.vlgmr.msrb.gmra.mxu0 %vm303_vm2, %v1555_v9 }
 0x275   :  { %743 = vmatpush.msra.mxu0 %v700_v4 }
 0x277   :  { %744 = vmatpush.msra.mxu0 %v699_v5 }
 0x27c   :  { %960 = vmatmul.msk.f32.vlgmr.msra.gmra.mxu0 %vm303_vm2, %v1573_v16 }
 0x2f1   :  { %v722_v8 = vpop.f32.mrf.mxu0 }
 0x2f9   :  { %v746_v10 = vpop.f32.mrf.mxu0 }
 0x2fa   :  { %v749_v13 = vmax.f32 %v722_v8, %v746_v10 }
 0x2fc   :  { %818 = vmatmul.f32.vlgmr.msrb.gmra.mxu3 %v749_v13  ;;  %782 = vmatmul.f32.vlgmr.msrb.gmra.mxu1 %v749_v13 }
 0x379   :  { %v783_v15 = vpop.f32.mrf.mxu1 }
 0x37f   :  { %v819_v17 = vpop.f32.mrf.mxu3 }
 0x380   :  { %v822_v20 = vmax.f32 %v783_v15, %v819_v17 }
 0x382   :  { %977 = vst.msk [vmem:[%s1765_s7 + $0x8] sm:$0xff] %vm31_vm1, %v822_v20 }

</bundles_post_ra>
